<compile_context>
chip_gen: v7x
topology: tpu7x:2x2x1
jax: 0.10.0
libtpu: 0.0.40
codegen_flags: <defaults>
</compile_context>

<pallas_src>
import functools

import jax
import jax.numpy as jnp
from jax.experimental import pallas as pl
from jax.experimental.pallas import tpu as pltpu


def _cdiv(a, b):
    return -(-a // b)


def _round_up(a, b):
    return _cdiv(a, b) * b


def attention_kernel(feats_ref, att2_ref, wf_t_ref, wfull_ref, out_ref, *,
                     approx_recip):
    # feats_ref : (Tb, N, F)  compute dtype (bf16 or f32)
    # att2_ref  : (Tb, A)     f32; decoder_att(h) + bd + bf (biases folded in wrapper)
    # wf_t_ref  : (F, A)      compute dtype, pre-transposed features_att weight
    # wfull_ref : (1, A)      f32 (full_att weight row; its bias cancels in softmax)
    # out_ref   : (Tb, F)     f32
    feats = feats_ref[...]                                       # (Tb, N, F)

    # att1 = features_att(image_features): 3-D dot_general contracting F on the
    # MXU with f32 accumulate.  No (Tb*N, F) reshape -> no relayout copy when N
    # is not a multiple of 8.
    att1 = jax.lax.dot_general(
        feats, wf_t_ref[...],
        dimension_numbers=(((2,), (0,)), ((), ())),
        preferred_element_type=jnp.float32)                      # (Tb, N, A)

    # relu(att1 + (att2 + bd + bf)); dropout == identity (eval mode)
    h = jnp.maximum(att1 + att2_ref[...][:, None, :], 0.0)       # (Tb, N, A) f32

    # full_att(...): contract A on the VPU/XLU -> lane-major (Tb, N) scores.
    # (Kept off the MXU: a (.,A)@(A,1) result is 1 lane wide and needs a relayout.)
    scores = jnp.sum(h * wfull_ref[...][None, :, :], axis=-1)    # (Tb, N)

    # softmax over regions (lane reductions)
    m = jnp.max(scores, axis=-1, keepdims=True)                  # (Tb, 1)
    e = jnp.exp(scores - m)                                      # (Tb, N)
    denom = jnp.sum(e, axis=-1, keepdims=True)                   # (Tb, 1)
    if approx_recip:
        alpha = e * pl.reciprocal(denom, approx=True)            # EUP slot (bf16 path)
    else:
        alpha = e / denom                                        # exact (f32 path)

    # (image_features * alpha.unsqueeze(2)).sum(dim=1): VPU broadcast-multiply +
    # reduce over N (replaces Tb serialized 1-row MXU matmuls).  alpha stays f32;
    # the product is promoted to f32 before the accumulation.
    ctx = jnp.sum(feats * alpha[:, :, None], axis=1)             # (Tb, F) f32
    out_ref[...] = ctx.astype(out_ref.dtype)


def _vmem_limit_bytes():
    """Generation-aware scoped-VMEM limit (v5e/v6e: 128 MiB physical, v7x: 64 MiB)."""
    try:
        phys = int(pltpu.get_tpu_info().vmem_capacity_bytes)
    except Exception:
        phys = 64 * 1024 * 1024          # conservative (v7x-sized) if query fails
    if phys >= 100 * 1024 * 1024:        # v5e / v6e
        return 96 * 1024 * 1024
    return 44 * 1024 * 1024              # v7x


def attention_forward(image_features, decoder_hidden, params, *,
                      block_b=None, compute_dtype=jnp.bfloat16):
    B, N, F = image_features.shape
    A = params["wf"].shape[0]
    dtsize = jnp.dtype(compute_dtype).itemsize

    # Hoisted: att2 = decoder_att(decoder_hidden) is regions-independent -> one
    # well-shaped (B, D) @ (D, A) matmul in plain XLA.  The features_att bias bf
    # is folded in here so the kernel does a single broadcast add.
    att2 = (decoder_hidden.astype(jnp.float32)
            @ params["wd"].T.astype(jnp.float32)
            + params["bd"].astype(jnp.float32)
            + params["bf"].astype(jnp.float32))                  # (B, A) f32

    # Pre-transposed / pre-cast weights (layout plumbing in the wrapper is free).
    wf_t = params["wf"].T.astype(compute_dtype)                  # (F, A)
    wfull = params["wfull"].reshape(1, A).astype(jnp.float32)    # (1, A)
    # params["bfull"] intentionally unused: softmax is shift-invariant.

    feats = image_features.astype(compute_dtype)                 # (B, N, F)

    vmem_limit = _vmem_limit_bytes()

    if block_b is None:
        # Size Tb from the VMEM budget: double-buffered feats/att2/out blocks,
        # single-buffered resident weights, plus f32 elementwise temps.
        per_row = (2 * (N * F * dtsize + A * 4 + F * 4)          # streamed blocks (x2 buf)
                   + N * F * 4                                   # f32 ctx product temp
                   + 2 * N * A * 4)                              # att1 / h f32 temps
        resident = F * A * dtsize + A * 4                        # Wf^T + Wfull (single-buf)
        usable = max(per_row, int(0.7 * vmem_limit) - resident)
        tb_budget = max(8, (usable // per_row) // 8 * 8)
        # Keep >= ~4 grid steps so the pipeline overlaps and v7x's two TCs both
        # get batch blocks under dimension_semantics=("parallel",).
        tb_steps = max(8, _round_up(_cdiv(B, 4), 8))
        tb = int(min(tb_budget, tb_steps))
    else:
        tb = max(8, _round_up(int(block_b), 8))

    b_pad = _round_up(B, tb)
    if b_pad != B:
        feats = jnp.pad(feats, ((0, b_pad - B), (0, 0), (0, 0)))
        att2 = jnp.pad(att2, ((0, b_pad - B), (0, 0)))
    # NOTE: the regions axis N is never padded (block == full N), so no -inf
    # score masking is needed; padded batch rows yield finite junk that is
    # sliced off at return.

    grid = (b_pad // tb,)

    grid_spec = pltpu.PrefetchScalarGridSpec(
        num_scalar_prefetch=0,
        grid=grid,
        in_specs=[
            pl.BlockSpec((tb, N, F), lambda i: (i, 0, 0)),       # feats (streamed)
            pl.BlockSpec((tb, A), lambda i: (i, 0)),             # att2  (streamed)
            pl.BlockSpec((F, A), lambda i: (0, 0),
                         pipeline_mode=pl.Buffered(1)),          # Wf^T  (resident, 1-buf)
            pl.BlockSpec((1, A), lambda i: (0, 0),
                         pipeline_mode=pl.Buffered(1)),          # Wfull (resident, 1-buf)
        ],
        out_specs=pl.BlockSpec((tb, F), lambda i: (i, 0)),
    )

    cost = pl.CostEstimate(
        flops=int(2 * b_pad * N * F * A      # att1 matmul (dominant)
                  + 2 * b_pad * N * F        # ctx multiply-reduce
                  + 5 * b_pad * N * A),      # elementwise add/relu/score
        transcendentals=int(b_pad * N),      # exp in softmax
        bytes_accessed=int(b_pad * N * F * dtsize + b_pad * A * 4
                           + F * A * dtsize + A * 4 + b_pad * F * 4),
    )

    kernel = functools.partial(
        attention_kernel,
        approx_recip=(jnp.dtype(compute_dtype) != jnp.dtype(jnp.float32)))

    out = pl.pallas_call(
        kernel,
        out_shape=jax.ShapeDtypeStruct((b_pad, F), jnp.float32),
        grid_spec=grid_spec,
        cost_estimate=cost,
        compiler_params=pltpu.CompilerParams(
            dimension_semantics=("parallel",),   # batch blocks independent (v7x: 2 TCs)
            vmem_limit_bytes=vmem_limit),
    )(feats, att2, wf_t, wfull)

    return out[:B]


def make_weightnorm_linear(key, out_dim, in_dim):
    """Deterministic init of a weight-normed Linear: W = g * V / ||V||_row."""
    kv, kg, kb = jax.random.split(key, 3)
    v = jax.random.normal(kv, (out_dim, in_dim), jnp.float32) * 0.1
    g = 1.0 + 0.01 * jax.random.normal(kg, (out_dim, 1), jnp.float32)
    b = 0.01 * jax.random.normal(kb, (out_dim,), jnp.float32)
    w = g * v / jnp.sqrt(jnp.sum(v * v, axis=1, keepdims=True))
    return w, b


def reference_forward(image_features, decoder_hidden, params):
    """Plain-JAX f32 reference mirroring the PyTorch forward (eval-mode dropout)."""
    att1 = image_features @ params["wf"].T + params["bf"]               # (B, N, A)
    att2 = decoder_hidden @ params["wd"].T + params["bd"]               # (B, A)
    h = jnp.maximum(att1 + att2[:, None, :], 0.0)                       # (B, N, A)
    att = (h @ params["wfull"].T + params["bfull"])[..., 0]             # (B, N)
    alpha = jax.nn.softmax(att, axis=1)                                 # (B, N)
    return jnp.sum(image_features * alpha[..., None], axis=1)           # (B, F)


if __name__ == "__main__":
    B, N, F, D, A = 16, 64, 128, 128, 128

    key = jax.random.PRNGKey(0)
    k_feat, k_hid, k1, k2, k3 = jax.random.split(key, 5)

    image_features = jax.random.normal(k_feat, (B, N, F), jnp.float32)
    decoder_hidden = jax.random.normal(k_hid, (B, D), jnp.float32)

    wf, bf = make_weightnorm_linear(k1, A, F)        # features_att
    wd, bd = make_weightnorm_linear(k2, A, D)        # decoder_att
    wfull, bfull = make_weightnorm_linear(k3, 1, A)  # full_att

    params = {"wf": wf, "bf": bf, "wd": wd, "bd": bd,
              "wfull": wfull, "bfull": bfull}

    ref = reference_forward(image_features, decoder_hidden, params)

    # Fast path: bf16 feats/weights on the MXU, f32 accumulate, auto-sized Tb.
    out_bf16 = jax.block_until_ready(
        attention_forward(image_features, decoder_hidden, params,
                          compute_dtype=jnp.bfloat16))
    assert out_bf16.shape == (B, F)
    assert jnp.allclose(out_bf16, ref, atol=4e-2, rtol=4e-2), "bf16 mismatch vs reference"

    # f32 path (exact reciprocal): tight structural check of the kernel.
    out_f32 = jax.block_until_ready(
        attention_forward(image_features, decoder_hidden, params,
                          compute_dtype=jnp.float32))
    assert jnp.allclose(out_f32, ref, atol=2e-3, rtol=2e-3), "f32 mismatch vs reference"

    # Ragged batch exercises the pad-to-block path.
    out_small = jax.block_until_ready(
        attention_forward(image_features[:2], decoder_hidden[:2], params,
                          compute_dtype=jnp.float32))
    assert jnp.allclose(out_small, ref[:2], atol=2e-3, rtol=2e-3), "padded-batch mismatch"

    # Explicit block_b override path (user-tuned Tb).
    out_blk = jax.block_until_ready(
        attention_forward(image_features, decoder_hidden, params,
                          block_b=16, compute_dtype=jnp.float32))
    assert jnp.allclose(out_blk, ref, atol=2e-3, rtol=2e-3), "block_b override mismatch"

    print("KERNEL_OK")
</pallas_src>

<mosaic_0001>
module attributes {stable_mosaic.version = 11 : i64} {
  func.func @attention_kernel(%arg0: i32, %arg1: memref<8x64x128xbf16, #tpu.memory_space<vmem>>, %arg2: memref<8x128xf32, #tpu.memory_space<vmem>>, %arg3: memref<128x128xbf16, #tpu.memory_space<vmem>>, %arg4: memref<1x128xf32, #tpu.memory_space<vmem>>, %arg5: memref<8x128xf32, #tpu.memory_space<vmem>>) attributes {dimension_semantics = [#tpu.dimension_semantics<parallel>], iteration_bounds = array<i64: 2>, scalar_prefetch = 0 : i64, scratch_operands = 0 : i64, tpu.core_type = #tpu.core_type<tc>, window_params = [{transform_indices = @transform_0, window_bounds = array<i64: 8, 64, 128>}, {transform_indices = @transform_1, window_bounds = array<i64: 8, 128>}, {pipeline_mode = #tpu.pipeline_mode<synchronous>, transform_indices = @transform_2, window_bounds = array<i64: 128, 128>}, {pipeline_mode = #tpu.pipeline_mode<synchronous>, transform_indices = @transform_3, window_bounds = array<i64: 1, 128>}, {transform_indices = @transform_4, window_bounds = array<i64: 8, 128>}]} {
    %c0 = arith.constant 0 : index
    %c0_0 = arith.constant 0 : index
    %c0_1 = arith.constant 0 : index
    %0 = vector.load %arg1[%c0, %c0_0, %c0_1] : memref<8x64x128xbf16, #tpu.memory_space<vmem>>, vector<8x64x128xbf16>
    %c0_2 = arith.constant 0 : index
    %c0_3 = arith.constant 0 : index
    %1 = vector.load %arg3[%c0_2, %c0_3] : memref<128x128xbf16, #tpu.memory_space<vmem>>, vector<128x128xbf16>
    %cst = arith.constant dense<0.000000e+00> : vector<8x64x128xf32>
    %2 = tpu.matmul %0, %1, %cst {dimension_numbers = #tpu.dot_dimension_numbers<[2], [0], [0, 1], [1], [0, 0, 0, 1, 1, 1], [], []>} : vector<8x64x128xbf16>, vector<128x128xbf16>, vector<8x64x128xf32> -> vector<8x64x128xf32>
    %c0_4 = arith.constant 0 : index
    %c0_5 = arith.constant 0 : index
    %3 = vector.load %arg2[%c0_4, %c0_5] : memref<8x128xf32, #tpu.memory_space<vmem>>, vector<8x128xf32>
    %4 = vector.shape_cast %3 : vector<8x128xf32> to vector<8x1x128xf32>
    %5 = vector.broadcast %4 : vector<8x1x128xf32> to vector<8x64x128xf32>
    %6 = arith.addf %2, %5 : vector<8x64x128xf32>
    %cst_6 = arith.constant 0.000000e+00 : f32
    %7 = vector.broadcast %cst_6 : f32 to vector<8x64x128xf32>
    %8 = arith.maximumf %6, %7 : vector<8x64x128xf32>
    %c0_7 = arith.constant 0 : index
    %c0_8 = arith.constant 0 : index
    %9 = vector.load %arg4[%c0_7, %c0_8] : memref<1x128xf32, #tpu.memory_space<vmem>>, vector<1x128xf32>
    %10 = vector.shape_cast %9 : vector<1x128xf32> to vector<1x1x128xf32>
    %11 = vector.broadcast %10 : vector<1x1x128xf32> to vector<8x64x128xf32>
    %12 = arith.mulf %8, %11 : vector<8x64x128xf32>
    %cst_9 = arith.constant dense<0.000000e+00> : vector<8x64xf32>
    %13 = vector.multi_reduction <add>, %12, %cst_9 [2] : vector<8x64x128xf32> to vector<8x64xf32>
    %cst_10 = arith.constant dense<0xFF800000> : vector<8xf32>
    %14 = vector.multi_reduction <maximumf>, %13, %cst_10 [1] : vector<8x64xf32> to vector<8xf32>
    %15 = vector.shape_cast %14 : vector<8xf32> to vector<8x1xf32>
    %16 = vector.broadcast %15 : vector<8x1xf32> to vector<8x64xf32>
    %17 = arith.subf %13, %16 : vector<8x64xf32>
    %18 = math.exp %17 : vector<8x64xf32>
    %cst_11 = arith.constant dense<0.000000e+00> : vector<8xf32>
    %19 = vector.multi_reduction <add>, %18, %cst_11 [1] : vector<8x64xf32> to vector<8xf32>
    %20 = vector.shape_cast %19 : vector<8xf32> to vector<8x1xf32>
    %21 = tpu.reciprocal %20 {approx = true} : vector<8x1xf32> -> vector<8x1xf32>
    %22 = vector.broadcast %21 : vector<8x1xf32> to vector<8x64xf32>
    %23 = arith.mulf %18, %22 : vector<8x64xf32>
    %24 = vector.shape_cast %23 : vector<8x64xf32> to vector<8x64x1xf32>
    %25 = arith.extf %0 : vector<8x64x128xbf16> to vector<8x64x128xf32>
    %26 = vector.broadcast %24 : vector<8x64x1xf32> to vector<8x64x128xf32>
    %27 = arith.mulf %25, %26 : vector<8x64x128xf32>
    %cst_12 = arith.constant dense<0.000000e+00> : vector<8x128xf32>
    %28 = vector.multi_reduction <add>, %27, %cst_12 [1] : vector<8x64x128xf32> to vector<8x128xf32>
    %c0_13 = arith.constant 0 : index
    %c0_14 = arith.constant 0 : index
    %29 = vector.load %arg5[%c0_13, %c0_14] : memref<8x128xf32, #tpu.memory_space<vmem>>, vector<8x128xf32>
    tpu.vector_store %arg5[%c0_13, %c0_14], %28 {strides = array<i32>} : memref<8x128xf32, #tpu.memory_space<vmem>>, vector<8x128xf32>,
    return
  }
  func.func @transform_0(%arg0: i32) -> (i32, i32, i32) {
    %c0_i32 = arith.constant 0 : i32
    %c0_i32_0 = arith.constant 0 : i32
    %c0_i32_1 = arith.constant 0 : i32
    return %arg0, %c0_i32, %c0_i32_0 : i32, i32, i32
  }
  func.func @transform_1(%arg0: i32) -> (i32, i32) {
    %c0_i32 = arith.constant 0 : i32
    %c0_i32_0 = arith.constant 0 : i32
    return %arg0, %c0_i32 : i32, i32
  }
  func.func @transform_2(%arg0: i32) -> (i32, i32) {
    %c0_i32 = arith.constant 0 : i32
    %c0_i32_0 = arith.constant 0 : i32
    %c0_i32_1 = arith.constant 0 : i32
    return %c0_i32, %c0_i32_0 : i32, i32
  }
  func.func @transform_3(%arg0: i32) -> (i32, i32) {
    %c0_i32 = arith.constant 0 : i32
    %c0_i32_0 = arith.constant 0 : i32
    %c0_i32_1 = arith.constant 0 : i32
    return %c0_i32, %c0_i32_0 : i32, i32
  }
  func.func @transform_4(%arg0: i32) -> (i32, i32) {
    %c0_i32 = arith.constant 0 : i32
    %c0_i32_0 = arith.constant 0 : i32
    return %arg0, %c0_i32 : i32, i32
  }
}

</mosaic_0001>

<bundles_post_ra>
// kernel: tpu_custom_call.1
= control target key start
LH: loop header
LB: loop body
LE: loop exit
PB: predicated region body
PF: predicated region fallthrough
CT: control target
= control target key end

     0   :  { %s5698_s0 = inlined_call_operand.hbm [shape: bf16[16,64,128], index: 0, kind: input, shape index: {}]   ;;  %s5699_s1 = inlined_call_operand.hbm [shape: f32[16,128], index: 1, kind: input, shape index: {}]   ;;  %s5700_s2 = inlined_call_operand.hbm [shape: bf16[128,128], index: 2, kind: input, shape index: {}]   ;;  %s5701_s3 = inlined_call_operand.vmem [shape: f32[1,128], index: 3, kind: input, shape index: {}]   ;;  %s5702_s4 = inlined_call_operand.hbm [shape: f32[16,128], index: 4, kind: output, shape index: {}]  }
   0x1   :  { %5798 = sst [smem:[#allocation64_spill]] %s5698_s0 }
   0x2   :  { %5799 = sst [smem:[#allocation65_spill]] %s5700_s2 }
   0x3   :  { %9 = vsyncpa [#allocation3], 0 }
   0x4   :  { %11 = vsyncpa [#allocation3 + $0x1], 0 }
   0x5   :  { %12 = vsyncpa [#allocation6], 0 }
   0x6   :  { %14 = vsyncpa [#allocation6 + $0x1], 0 }
   0x7   :  { %15 = vsyncpa [#allocation4], 0 }
   0x8   :  { %17 = vsyncpa [#allocation4 + $0x1], 0  ;;  %s3945_s15 = smov 0   ;;  %s3947_s16 = smov 0  }
   0x9   :  { %s3949_s17 = smov 0   ;;  %s3951_s18 = smov 0  }
   0xa LB: > { %s3966_s19 = sadd.s32 4294967295, %s3910_s18   ;;  %s3247_s20 = sadd.s32 4294967294, %s3910_s18   ;;  %s3910_s18 = sphi %s3951_s18, %s5987_s18   ;;  %s3906_s17 = sphi %s3949_s17, %s5986_s17   ;;  %s3902_s16 = sphi %s3947_s16, %s5985_s16   ;;  %s3898_s15 = sphi %s3945_s15, %s5984_s15  }
   0xb   : > { %p43_p0 = scmp.ne.s32.totalorder %s3902_s16, %s3898_s15  ;;  %p5703_p1 = scmp.eq.s32.totalorder %s3966_s19, 0 }
   0xc   : > { %p141_p3 = scmp.eq.s32.totalorder %s3247_s20, 1  ;;  %p3248_p5 = scmp.ge.s32.totalorder %s3910_s18, 1 }
   0xd   : > { %p3975_p4 = por %p5703_p1, %p43_p0  ;;  %p148_p7 = scmp.lt.s32.totalorder %s3910_s18, 3 }
   0xe   : > { %p3980_p6 = por %p141_p3, %p43_p0  ;;  %s3912_s24 = smov [#allocation7]  }
   0xf   : > { %s5800_s21 = scalar_select %p3975_p4, 1, 0 }
  0x10   : > { %s5801_s22 = scalar_select %p3980_p6, 1, 0 }
  0x11   : > { %p3985_p8 = pnand %p3248_p5, %p148_p7  ;;  %s160_s25 = sshll.u32 %s3912_s24, 4  ;;  %s3989_s25 = int_to_ptr.vmem [resolvable:$true] %s160_s25 }
  0x12   : > { %s4001_s27 = sadd.s32 1, %s3910_s18   ;;  %s30_s28 = sadd.s32 1, %s3906_s17 }
  0x13   : > { %s5802_s23 = scalar_select %p3985_p8, 1, 0 }
  0x14   : > { %p3455_p9 = pneg %p3985_p8  ;;  %s27_s29 = ssub.s32 %s3910_s18, %s4001_s27 }
  0x15   : > { %s5804_s2 = sld [smem:[#allocation65_spill]] }
  0x16   : > { %p3996_p11 = pnand %p3455_p9, %p5703_p1 }
  0x18   : > { %p3750_p13 = pneg %p3996_p11 }
  0x1b   : > { %s3748_s6 = scalar_lea.hbm %s5804_s2, 1024 }
  0x1c   : > { %p3749_p12 = scmp.ne.s32.totalorder %s5804_s2, %s3748_s6  ;;  %p3755_p5 = scmp.lt.u32.totalorder %s3748_s6, %s5804_s2 }
  0x1e   : > { %p3751_p0 = pnand %p3750_p13, %p3749_p12 }
  0x20   : > { %p3752_p3 = pneg %p3751_p0 }
  0x22   : > { %p3757_p7 = pnand %p3755_p5, %p3752_p3 }
  0x24   : > { %3760 = shalt.err (!%p3757_p7)
}
  0x25   : > { %s3761_s11 = scalar_lea.vmem %s3989_s25, 1024  ;;  %p3769_p2 = scmp.lt.s32.totalorder %s3989_s25, %s3989_s25 }
  0x26   : > { %p3762_p9 = scmp.ne.s32.totalorder %s3989_s25, %s3761_s11  ;;  %p3770_p6 = scmp.lt.s32.totalorder %s3761_s11, %s3761_s11 }
  0x28   : > { %p3764_p10 = pnand %p3762_p9, %p3750_p13  ;;  %p3771_p4 = por %p3770_p6, %p3769_p2 }
  0x2a   : > { %p3765_p1 = pneg %p3764_p10 }
  0x2c   : > { %p3772_p8 = pnand %p3771_p4, %p3765_p1 }
  0x2e   : > { %3775 = shalt.err (!%p3772_p8)
}
  0x2f   : > { %s3913_s12 = smov 64   ;;  %s3914_s13 = smov 4  }
  0x30   : > { %3458 = dma.hbm_to_vmem [thread:$0]  (!%p3996_p11), %s5804_s2, 1024, %s3989_s25, [#allocation6], %s3913_s12, %s3913_s12, %s3914_s13  }
  0x31   : > { %p28_p1 = scmp.eq.s32.totalorder %s27_s29, 0  ;;  %p37_p2 = scmp.ne.s32.totalorder %s3906_s17, %s3902_s16 }
  0x32   : > { %p38_p4 = scmp.eq.s32.totalorder %s3910_s18, 0  ;;  %p3471_p6 = scmp.lt.s32.totalorder %s3910_s18, 2 }
  0x33   : > { %s4035_s24 = scalar_select %p28_p1, %s3906_s17, %s30_s28  }
  0x34   : > { %p39_p8 = por %p38_p4, %p37_p2  ;;  %p5805_p10 = scmp.eq.s32.totalorder %s3966_s19, 1 }
  0x35   : > { %s4044_s26 = sand.u32 1, %s3906_s17   ;;  %s3308_s5 = sshll.u32 %s3910_s18, 12 }
  0x36   : > { %p4039_p12 = por %p5805_p10, %p37_p2  ;;  %s3251_s6 = sshll.u32 %s4044_s26, 8 }
  0x37   : > { %s5807_s0 = sld [smem:[#allocation64_spill]]  ;;  %s181_s28 = scalar_lea.vmem [#allocation2], %s3251_s6 }
  0x38   : > { %s5806_s30 = scalar_select %p4039_p12, 1, 0 }
  0x39   : > { %s189_s8 = sshll.u32 %s181_s28, 4  ;;  %p4053_p11 = pnand %p3471_p6, %p39_p8  ;;  %s4057_s8 = int_to_ptr.vmem [resolvable:$true] %s189_s8 }
  0x3a   : > { %s199_s10 = sand.u32 1, %s3910_s18   ;;  %s178_s11 = scalar_lea.sflag [#allocation3], %s4044_s26 }
  0x3b   : > { %p3778_p0 = pneg %p4053_p11 }
  0x3d   : > { %s4051_s29 = scalar_lea.hbm %s5807_s0, %s3308_s5  ;;  %s3781_s6 = scalar_lea.hbm %s5807_s0, 8192 }
  0x3e   : > { %s3776_s14 = scalar_lea.hbm %s4051_s29, 4096  ;;  %p3782_p7 = scmp.lt.u32.totalorder %s4051_s29, %s5807_s0 }
  0x3f   : > { %p3777_p13 = scmp.ne.s32.totalorder %s4051_s29, %s3776_s14  ;;  %p3783_p9 = scmp.lt.u32.totalorder %s3781_s6, %s3776_s14 }
  0x40   : > { %p3785_p2 = scmp.lt.u32.totalorder %s3776_s14, %s4051_s29 }
  0x41   : > { %p3779_p3 = pnand %p3778_p0, %p3777_p13  ;;  %p3784_p1 = por %p3783_p9, %p3782_p7 }
  0x43   : > { %p3780_p5 = pneg %p3779_p3  ;;  %p3786_p4 = por %p3785_p2, %p3784_p1 }
  0x45   : > { %p3787_p6 = pnand %p3786_p4, %p3780_p5 }
  0x47   : > { %3790 = shalt.err (!%p3787_p6)
}
  0x48   : > { %s3791_s28 = scalar_lea.vmem %s4057_s8, 4096  ;;  %s3915_s20 = smov [#allocation2]  }
  0x49   : > { %p3792_p8 = scmp.ne.s32.totalorder %s4057_s8, %s3791_s28  ;;  %s3796_s5 = sshll.u32 %s3915_s20, 4  ;;  %s3797_s5 = int_to_ptr.vmem [resolvable:$false] %s3796_s5 }
  0x4a   : > { %s3798_s25 = scalar_lea.vmem %s3797_s5, 8192  ;;  %p3799_p3 = scmp.lt.s32.totalorder %s4057_s8, %s3797_s5 }
  0x4b   : > { %p3794_p10 = pnand %p3792_p8, %p3778_p0  ;;  %p3800_p7 = scmp.lt.s32.totalorder %s3798_s25, %s3791_s28 }
  0x4d   : > { %p3795_p13 = pneg %p3794_p10  ;;  %p3801_p9 = por %p3800_p7, %p3799_p3 }
  0x4f   : > { %p3802_p1 = pnand %p3801_p9, %p3795_p13 }
  0x51   : > { %3805 = shalt.err (!%p3802_p1)
}
  0x52   : > { %3462 = dma.hbm_to_vmem [thread:$0]  (!%p4053_p11), %s4051_s29, 4096, %s4057_s8, %s178_s11, %s3913_s12, %s3913_s12, %s3914_s13  }
  0x53   : > { %s3255_s14 = sshll.u32 %s4044_s26, 3  ;;  %s3256_s6 = sshll.u32 %s3910_s18, 7 }
  0x54   : > { %s4096_s20 = scalar_lea.hbm %s5699_s1, %s3256_s6  ;;  %s203_s5 = scalar_lea.vmem [#allocation5], %s3255_s14 }
  0x55   : > { %s210_s25 = sshll.u32 %s203_s5, 4  ;;  %s200_s0 = scalar_lea.sflag [#allocation6], %s199_s10  ;;  %s211_s25 = int_to_ptr.vmem [resolvable:$true] %s210_s25 }
  0x56   : > { %s3806_s2 = scalar_lea.hbm %s4096_s20, 128  ;;  %s3811_s26 = scalar_lea.hbm %s5699_s1, 256 }
  0x57   : > { %p3807_p5 = scmp.ne.s32.totalorder %s4096_s20, %s3806_s2  ;;  %p3812_p6 = scmp.lt.u32.totalorder %s4096_s20, %s5699_s1 }
  0x58   : > { %p3813_p8 = scmp.lt.u32.totalorder %s3811_s26, %s3806_s2  ;;  %p3815_p13 = scmp.lt.u32.totalorder %s3806_s2, %s4096_s20 }
  0x59   : > { %p3809_p2 = pnand %p3807_p5, %p3778_p0 }
  0x5a   : > { %p3814_p10 = por %p3813_p8, %p3812_p6 }
  0x5b   : > { %p3810_p4 = pneg %p3809_p2 }
  0x5c   : > { %p3816_p3 = por %p3815_p13, %p3814_p10 }
  0x5e   : > { %p3817_p7 = pnand %p3816_p3, %p3810_p4 }
  0x60   : > { %3820 = shalt.err (!%p3817_p7)
}
  0x61   : > { %s3821_s10 = scalar_lea.vmem %s211_s25, 128  ;;  %s3916_s11 = smov [#allocation5]  }
  0x62   : > { %p3822_p9 = scmp.ne.s32.totalorder %s211_s25, %s3821_s10  ;;  %s3826_s14 = sshll.u32 %s3916_s11, 4  ;;  %s3827_s14 = int_to_ptr.vmem [resolvable:$false] %s3826_s14 }
  0x63   : > { %s3828_s6 = scalar_lea.vmem %s3827_s14, 256  ;;  %p3829_p2 = scmp.lt.s32.totalorder %s211_s25, %s3827_s14 }
  0x64   : > { %p3824_p1 = pnand %p3822_p9, %p3778_p0  ;;  %p3830_p12 = scmp.lt.s32.totalorder %s3828_s6, %s3821_s10 }
  0x66   : > { %p3825_p5 = pneg %p3824_p1  ;;  %p3831_p6 = por %p3830_p12, %p3829_p2 }
  0x68   : > { %p3832_p8 = pnand %p3831_p6, %p3825_p5 }
  0x6a   : > { %3835 = shalt.err (!%p3832_p8)
}
  0x6b   : > { %3465 = dma.hbm_to_vmem [thread:$0]  (!%p4053_p11), %s4096_s20, 128, %s211_s25, %s200_s0  }
  0x6c   : > { %p5809_p4 = scmp.ne.s32.totalorder %s5802_s23, 0 }
  0x6e   : > { %219 = sbr.rel (%p5809_p4) target bundleno = 1547 (0x60b), region = 36 }
  0x75   : > { %s4122_s2 = sand.u32 1, %s3902_s16   ;;  %p5810_p12 = scmp.ne.s32.totalorder %s5800_s21, 0 }
  0x76   : > { %s3258_s7 = sshll.u32 %s4122_s2, 8  ;;  %s222_s28 = scalar_lea.sflag [#allocation3], %s4122_s2 }
  0x77   : > { %s4126_s5 = scalar_lea.vmem [#allocation2], %s3258_s7 }
  0x78   : > { %3881 = dma.done.wait (%p5810_p12), %s222_s28, 4096  }
  0x79   : > { %3883 = vsyncadd (%p5810_p12), %s222_s28, 4294963200  ;;  %s230_s0 = sand.u32 1, %s3966_s19   ;;  %s3259_s23 = sshll.u32 %s4122_s2, 3 }
  0x7a   : > { %s231_s9 = scalar_lea.sflag [#allocation6], %s230_s0  ;;  %s4136_s20 = scalar_lea.vmem [#allocation5], %s3259_s23 }
  0x7b   : > { %3885 = dma.done.wait (%p5810_p12), %s231_s9, 128  }
  0x7c   : > { %3887 = vsyncadd (%p5810_p12), %s231_s9, 4294967168  ;;  %p5811_p11 = scmp.eq.s32.totalorder %s3966_s19, 0 }
  0x7e   : > { %3889 = dma.done.wait (%p5811_p11), [#allocation6], 1024   ;;  %p5812_p0 = pmov %p5811_p11 }
  0x7f   : > { %v3513_v0 = vld [vmem:[#allocation7] sm:$0xff]   ;;  %v3514_v1 = vld [vmem:[#allocation7 + $0x8] sm:$0xff]   ;;  %v3515_v2 = vld [vmem:[#allocation7 + $0x10] sm:$0xff]   ;;  %v3917_v40 = vmov 1966171168   ;;  %v356_v42 = vlaneseq  ;;  %vm1308_vm0 = vcmask 130112  }
  0x80   : > { %3891 = vsyncadd (%p5812_p0), [#allocation6], 4294966272  ;;  %3349 = vmatprep.subr.bf16.mxu0 %v3513_v0  ;;  %3429 = vmatprep.subr.bf16.mxu1 %v3513_v0  ;;  %v3516_v3 = vld [vmem:[#allocation7 + $0x18] sm:$0xff]   ;;  %v270_v4 = vld [vmem:[%s4126_s5] sm:$0xff]   ;;  %v354_v41 = vunpack.c.l.s4 %v3917_v40  ;;  %vm1315_vm1 = vcmask 195712   ;;  %vm1322_vm2 = vcmask 261312  }
  0x81   : > { %3350 = vmatpush3.bf16.msra.mxu0 %v3513_v0  ;;  %3437 = vmatpush3.bf16.msra.mxu1 %v3513_v0  ;;  %v302_v5 = vld [vmem:[%s4126_s5 + $0x80] sm:$0xff]   ;;  %v3517_v6 = vld [vmem:[#allocation7 + $0x20] sm:$0xff]   ;;  %v3518_v7 = vld [vmem:[#allocation7 + $0x28] sm:$0xff]   ;;  %v4179_v44 = vshrl.u32 %v356_v42, 7  ;;  %vm1329_vm3 = vcmask 326912   ;;  %vm1336_vm4 = vcmask 392512  }
  0x82   : > { %3351 = vmatprep.subr.bf16.mxu0 %v3514_v1  ;;  %3430 = vmatprep.subr.bf16.mxu1 %v3514_v1  ;;  %v3519_v8 = vld [vmem:[#allocation7 + $0x30] sm:$0xff]   ;;  %v3520_v9 = vld [vmem:[#allocation7 + $0x38] sm:$0xff]   ;;  %v274_v12 = vld [vmem:[%s4126_s5 + $0x10] sm:$0xff]   ;;  %v355_v43 = vunpack.c.0.s8 %v354_v41  ;;  %vm1343_vm5 = vcmask 458112   ;;  %vm1350_vm6 = vcmask 523712   ;;  %vm1625_vm7 = vcmask 1041409  }
  0x83   : > { %3365 = vmatprep.mubr.bf16.mxu0 %v270_v4  ;;  %3397 = vmatprep.mubr.bf16.mxu1 %v302_v5  ;;  %v272_v10 = vld [vmem:[%s4126_s5 + $0x8] sm:$0xff]   ;;  %v306_v13 = vld [vmem:[%s4126_s5 + $0x90] sm:$0xff]   ;;  %v276_v14 = vld [vmem:[%s4126_s5 + $0x18] sm:$0xff]   ;;  %v4191_v51 = vsub.s32 0, %v4179_v44  ;;  %vm1627_vm8 = vcmask 1042434   ;;  %vm1629_vm9 = vcmask 1043459  }
  0x84   : > { %v304_v11 = vld [vmem:[%s4126_s5 + $0x88] sm:$0xff]   ;;  %v308_v15 = vld [vmem:[%s4126_s5 + $0x98] sm:$0xff]   ;;  %v278_v16 = vld [vmem:[%s4126_s5 + $0x20] sm:$0xff]   ;;  %v4183_v46 = vsub.s32 %v355_v43, %v4179_v44  ;;  %vm1631_vm10 = vcmask 1044484   ;;  %vm1633_vm11 = vcmask 1045509   ;;  %vm1635_vm12 = vcmask 1046534  }
  0x85   : > { %3352 = vmatpush3.bf16.msra.mxu0 %v3514_v1  ;;  %3438 = vmatpush3.bf16.msra.mxu1 %v3514_v1  ;;  %v310_v17 = vld [vmem:[%s4126_s5 + $0xa0] sm:$0xff]   ;;  %v280_v18 = vld [vmem:[%s4126_s5 + $0x28] sm:$0xff]   ;;  %v282_v20 = vld [vmem:[%s4126_s5 + $0x30] sm:$0xff]   ;;  %5813 = vst [vmem:[#allocation13_spill] sm:$0xff] %v4191_v51  ;;  %vm1637_vm13 = vcmask 1047559   ;;  %vm1640_vm14 = vcmask 523264  }
  0x86   : > { %3353 = vmatprep.subr.bf16.mxu0 %v3515_v2  ;;  %3431 = vmatprep.subr.bf16.mxu1 %v3515_v2  ;;  %v312_v19 = vld [vmem:[%s4126_s5 + $0xa8] sm:$0xff]   ;;  %v314_v21 = vld [vmem:[%s4126_s5 + $0xb0] sm:$0xff]   ;;  %v284_v22 = vld [vmem:[%s4126_s5 + $0x38] sm:$0xff]   ;;  %s3304_s12 = sshll.u32 %s3966_s19, 7  ;;  %s267_s13 = scalar_lea.vmem [#allocation8], %s3259_s23 }
  0x87   : > { %v316_v23 = vld [vmem:[%s4126_s5 + $0xb8] sm:$0xff]   ;;  %v286_v24 = vld [vmem:[%s4126_s5 + $0x40] sm:$0xff]   ;;  %v288_v26 = vld [vmem:[%s4126_s5 + $0x48] sm:$0xff]   ;;  %s3145_s26 = sshll.u32 %s267_s13, 4  ;;  %s5653_s10 = scalar_lea.hbm %s5702_s4, %s3304_s12  ;;  %s5655_s26 = int_to_ptr.vmem [resolvable:$true] %s3145_s26 }
  0x88   : > { %v318_v25 = vld [vmem:[%s4126_s5 + $0xc0] sm:$0xff]   ;;  %v320_v27 = vld [vmem:[%s4126_s5 + $0xc8] sm:$0xff]   ;;  %v290_v28 = vld [vmem:[%s4126_s5 + $0x50] sm:$0xff]   ;;  %s3132_s19 = scalar_lea.sflag [#allocation4], %s4122_s2  ;;  %s3836_s11 = scalar_lea.vmem %s5655_s26, 128 }
  0x89   : > { %3354 = vmatpush3.bf16.msra.mxu0 %v3515_v2  ;;  %3439 = vmatpush3.bf16.msra.mxu1 %v3515_v2  ;;  %v322_v29 = vld [vmem:[%s4126_s5 + $0xd0] sm:$0xff]   ;;  %v292_v30 = vld [vmem:[%s4126_s5 + $0x58] sm:$0xff]   ;;  %v294_v32 = vld [vmem:[%s4126_s5 + $0x60] sm:$0xff]   ;;  %p3837_p10 = scmp.ne.s32.totalorder %s5655_s26, %s3836_s11  ;;  %p5981_p13 = scmp.ne.s32.totalorder %s5806_s30, 0 }
  0x8a   : > { %3355 = vmatprep.subr.bf16.mxu0 %v3516_v3  ;;  %3432 = vmatprep.subr.bf16.mxu1 %v3516_v3  ;;  %v324_v31 = vld [vmem:[%s4126_s5 + $0xd8] sm:$0xff]   ;;  %v326_v33 = vld [vmem:[%s4126_s5 + $0xe0] sm:$0xff]   ;;  %v296_v34 = vld [vmem:[%s4126_s5 + $0x68] sm:$0xff]   ;;  %s3919_s14 = smov [#allocation8]  }
  0x8b   : > { %v328_v35 = vld [vmem:[%s4126_s5 + $0xe8] sm:$0xff]   ;;  %v298_v36 = vld [vmem:[%s4126_s5 + $0x70] sm:$0xff]   ;;  %v300_v38 = vld [vmem:[%s4126_s5 + $0x78] sm:$0xff]   ;;  %p3838_p3 = pnand %p3837_p10, %p5981_p13  ;;  %s3840_s6 = sshll.u32 %s3919_s14, 4  ;;  %s3841_s6 = int_to_ptr.vmem [resolvable:$false] %s3840_s6 }
  0x8c   : > { %v330_v37 = vld [vmem:[%s4126_s5 + $0xf0] sm:$0xff]   ;;  %v332_v39 = vld [vmem:[%s4126_s5 + $0xf8] sm:$0xff]   ;;  %v350_v45 = vld [vmem:[%s4136_s20] sm:$0xff]  ;;  %s3842_s7 = scalar_lea.vmem %s3841_s6, 256  ;;  %p3843_p9 = scmp.lt.s32.totalorder %s5655_s26, %s3841_s6 }
  0x8d   : > { %3356 = vmatpush3.bf16.msra.mxu0 %v3516_v3  ;;  %3440 = vmatpush3.bf16.msra.mxu1 %v3516_v3  ;;  %v352_v47 = vcombine.high %v350_v45, %v350_v45  ;;  %v359_v48 = vrot.slane %v350_v45, %v4183_v46  ;;  %v4210_v0 = vld [vmem:[%s5701_s3] ss:$0 sm:$0xff]  ;;  %p3839_p7 = pneg %p3838_p3  ;;  %p3844_p1 = scmp.lt.s32.totalorder %s3842_s7, %s3836_s11 }
  0x8e   : > { %3357 = vmatprep.subr.bf16.mxu0 %v3517_v6  ;;  %3433 = vmatprep.subr.bf16.mxu1 %v3517_v6 }
  0x8f   : > { %v366_v49 = vrot.slane %v352_v47, %v4183_v46  ;;  %v4188_v50 = vrot.slane %v359_v48, %v4183_v46  ;;  %p3845_p5 = por %p3844_p1, %p3843_p9 }
  0x91   : > { %3358 = vmatpush3.bf16.msra.mxu0 %v3517_v6  ;;  %3441 = vmatpush3.bf16.msra.mxu1 %v3517_v6  ;;  %v4194_v52 = vrot.slane %v366_v49, %v4183_v46  ;;  %v4198_v53 = vrot.slane %v4188_v50, %v4191_v51  ;;  %p3846_p2 = pnand %p3845_p5, %p3839_p7 }
  0x92   : > { %3359 = vmatprep.subr.bf16.mxu0 %v3518_v7  ;;  %3434 = vmatprep.subr.bf16.mxu1 %v3518_v7 }
  0x93   : > { %v4202_v54 = vrot.slane %v4194_v52, %v4191_v51 }
  0x95   : > { %3360 = vmatpush3.bf16.msra.mxu0 %v3518_v7  ;;  %3442 = vmatpush3.bf16.msra.mxu1 %v3518_v7 }
  0x96   : > { %3361 = vmatprep.subr.bf16.mxu0 %v3519_v8  ;;  %3435 = vmatprep.subr.bf16.mxu1 %v3519_v8 }
  0x99   : > { %3362 = vmatpush3.bf16.msra.mxu0 %v3519_v8  ;;  %3443 = vmatpush3.bf16.msra.mxu1 %v3519_v8 }
  0x9a   : > { %3363 = vmatprep.subr.bf16.mxu0 %v3520_v9  ;;  %3436 = vmatprep.subr.bf16.mxu1 %v3520_v9 }
  0x9d   : > { %3364 = vmatpush3.bf16.msra.mxu0 %v3520_v9  ;;  %3444 = vmatpush3.bf16.msra.mxu1 %v3520_v9 }
  0xa0   : > { %3366 = vmatmul.mubr.bf16.vlgmr.msra.gmra.mrb[0].mxu0 %v272_v10  ;;  %3398 = vmatmul.mubr.bf16.vlgmr.msra.gmra.mrb[0].mxu1 %v304_v11 }
  0xa1   : > { %3369 = vmatprep.mubr.bf16.mxu0 %v274_v12  ;;  %3401 = vmatprep.mubr.bf16.mxu1 %v306_v13 }
  0xa8   : > { %3370 = vmatmul.mubr.bf16.gmra.mrb[4].mxu0 %v276_v14  ;;  %3402 = vmatmul.mubr.bf16.gmra.mrb[4].mxu1 %v308_v15 }
  0xa9   : > { %3373 = vmatprep.mubr.bf16.mxu0 %v278_v16  ;;  %3405 = vmatprep.mubr.bf16.mxu1 %v310_v17 }
  0xb0   : > { %3374 = vmatmul.mubr.bf16.gmra.mrb[8].mxu0 %v280_v18  ;;  %3406 = vmatmul.mubr.bf16.gmra.mrb[8].mxu1 %v312_v19 }
  0xb1   : > { %3377 = vmatprep.mubr.bf16.mxu0 %v282_v20  ;;  %3409 = vmatprep.mubr.bf16.mxu1 %v314_v21 }
  0xb8   : > { %3378 = vmatmul.mubr.bf16.gmra.mrb[12].mxu0 %v284_v22  ;;  %3410 = vmatmul.mubr.bf16.gmra.mrb[12].mxu1 %v316_v23 }
  0xb9   : > { %3381 = vmatprep.mubr.bf16.mxu0 %v286_v24  ;;  %3413 = vmatprep.mubr.bf16.mxu1 %v318_v25  ;;  %v367_v24 = vcombine.high %v359_v48, %v359_v48 }
  0xc0   : > { %3382 = vmatmul.mubr.bf16.gmra.mrb[16].mxu0 %v288_v26  ;;  %3414 = vmatmul.mubr.bf16.gmra.mrb[16].mxu1 %v320_v27 }
  0xc1   : > { %3385 = vmatprep.mubr.bf16.mxu0 %v290_v28  ;;  %3417 = vmatprep.mubr.bf16.mxu1 %v322_v29  ;;  %v368_v29 = vcombine.high %v366_v49, %v366_v49 }
  0xc8   : > { %3386 = vmatmul.mubr.bf16.gmra.mrb[20].mxu0 %v292_v30  ;;  %3418 = vmatmul.mubr.bf16.gmra.mrb[20].mxu1 %v324_v31 }
  0xc9   : > { %3389 = vmatprep.mubr.bf16.mxu0 %v294_v32  ;;  %3421 = vmatprep.mubr.bf16.mxu1 %v326_v33 }
  0xd0   : > { %3390 = vmatmul.mubr.bf16.gmra.mrb[24].mxu0 %v296_v34  ;;  %3422 = vmatmul.mubr.bf16.gmra.mrb[24].mxu1 %v328_v35  ;;  %v4227_v35 = vrot.slane %v367_v24, %v4183_v46 }
  0xd1   : > { %3393 = vmatprep.mubr.bf16.mxu0 %v298_v36  ;;  %3425 = vmatprep.mubr.bf16.mxu1 %v330_v37 }
  0xd8   : > { %3394 = vmatmul.mubr.bf16.gmra.mrb[28].mxu0 %v300_v38  ;;  %3426 = vmatmul.mubr.bf16.gmra.mrb[28].mxu1 %v332_v39  ;;  %v4231_v39 = vrot.slane %v368_v29, %v4183_v46 }
 0x173   : > { %v3367_v55 = vpop.f32.mrb[0].mxu0  ;;  %v3399_v56 = vpop.f32.mrb[0].mxu1 }
 0x174   : > { %v724_v57 = vadd.f32 %v3367_v55, %v4198_v53  ;;  %v852_v58 = vadd.f32 %v3399_v56, %v4202_v54  ;;  %v715_v59 = vpop.f32.mrb[1].mxu0  ;;  %v843_v60 = vpop.f32.mrb[1].mxu1  ;;  %v4237_v55 = vrot.slane %v4227_v35, %v4191_v51 }
 0x175   : > { %v716_v61 = vadd.f32 %v715_v59, %v4198_v53  ;;  %v3368_v62 = vpop.f32.mrb[2].mxu0  ;;  %v3400_v63 = vpop.f32.mrb[2].mxu1  ;;  %v844_v6 = vadd.f32 %v843_v60, %v4202_v54 }
 0x176   : > { %v972_v1 = vmax.f32 %v724_v57, 0.0  ;;  %v1004_v2 = vmax.f32 %v852_v58, 0.0  ;;  %v727_v3 = vadd.f32 %v3368_v62, %v4198_v53  ;;  %v718_v4 = vpop.f32.mrb[3].mxu0  ;;  %v846_v5 = vpop.f32.mrb[3].mxu1  ;;  %v855_v7 = vadd.f32 %v3400_v63, %v4202_v54 }
 0x177   : > { %v970_v8 = vmax.f32 %v716_v61, 0.0  ;;  %v1002_v12 = vmax.f32 %v844_v6, 0.0  ;;  %v719_v13 = vadd.f32 %v718_v4, %v4198_v53  ;;  %v847_v17 = vadd.f32 %v846_v5, %v4202_v54 }
 0x178   : > { %v973_v9 = vmax.f32 %v727_v3, 0.0  ;;  %v1075_v10 = vmul.f32 %v4210_v0, %v1004_v2  ;;  %v1043_v11 = vmul.f32 %v4210_v0, %v972_v1  ;;  %v1005_v16 = vmax.f32 %v855_v7, 0.0 }
 0x179   : > { %v1041_v19 = vmul.f32 %v4210_v0, %v970_v8  ;;  %v971_v30 = vmax.f32 %v719_v13, 0.0  ;;  %v1003_v31 = vmax.f32 %v847_v17, 0.0  ;;  %v1073_v33 = vmul.f32 %v4210_v0, %v1002_v12 }
 0x17a   : > { %1173 = vadd.xlane.f32.xlu0 %v1075_v10  ;;  %1109 = vadd.xlane.f32.xlu1 %v1043_v11  ;;  %v1044_v18 = vmul.f32 %v4210_v0, %v973_v9  ;;  %v1076_v32 = vmul.f32 %v4210_v0, %v1005_v16  ;;  %v4243_v61 = vrot.slane %v4231_v39, %v4191_v51 }
 0x17b   : > { %v3371_v14 = vpop.f32.mrb[4].mxu0  ;;  %v3403_v15 = vpop.f32.mrb[4].mxu1  ;;  %v1074_v43 = vmul.f32 %v4210_v0, %v1003_v31  ;;  %v1042_v45 = vmul.f32 %v4210_v0, %v971_v30  ;;  %v397_v5 = vcombine.high %v4188_v50, %v4188_v50  ;;  %v398_v17 = vcombine.high %v4194_v52, %v4194_v52 }
 0x17c   : > { %v731_v20 = vpop.f32.mrb[5].mxu0  ;;  %v859_v21 = vpop.f32.mrb[5].mxu1  ;;  %v740_v25 = vadd.f32 %v3371_v14, %v4198_v53  ;;  %v868_v34 = vadd.f32 %v3403_v15, %v4202_v54 }
 0x17d   : > { %v3372_v22 = vpop.f32.mrb[6].mxu0  ;;  %v3404_v23 = vpop.f32.mrb[6].mxu1  ;;  %v732_v63 = vadd.f32 %v731_v20, %v4198_v53  ;;  %v860_v2 = vadd.f32 %v859_v21, %v4202_v54  ;;  %v4269_v21 = vrot.slane %v397_v5, %v4191_v51 }
 0x17e   : > { %1111 = vadd.xlane.f32.xlu1 %v1044_v18  ;;  %1105 = vadd.xlane.f32.xlu0 %v1041_v19  ;;  %v743_v26 = vadd.f32 %v3372_v22, %v4198_v53  ;;  %v734_v27 = vpop.f32.mrb[7].mxu0  ;;  %v862_v28 = vpop.f32.mrb[7].mxu1  ;;  %v976_v36 = vmax.f32 %v740_v25, 0.0  ;;  %v871_v38 = vadd.f32 %v3404_v23, %v4202_v54  ;;  %v1008_v49 = vmax.f32 %v868_v34, 0.0 }
 0x17f   : > { %v735_v1 = vadd.f32 %v734_v27, %v4198_v53  ;;  %v863_v3 = vadd.f32 %v862_v28, %v4202_v54  ;;  %v974_v13 = vmax.f32 %v732_v63, 0.0  ;;  %v1006_v18 = vmax.f32 %v860_v2, 0.0 }
 0x180   : > { %v977_v37 = vmax.f32 %v743_v26, 0.0  ;;  %v1009_v58 = vmax.f32 %v871_v38, 0.0  ;;  %v1047_v59 = vmul.f32 %v4210_v0, %v976_v36  ;;  %v1079_v4 = vmul.f32 %v4210_v0, %v1008_v49 }
 0x181   : > { %v975_v50 = vmax.f32 %v735_v1, 0.0  ;;  %v399_v22 = vcombine.high %v4227_v35, %v4227_v35  ;;  %v400_v23 = vcombine.high %v4231_v39, %v4231_v39  ;;  %v1007_v24 = vmax.f32 %v863_v3, 0.0 }
 0x182   : > { %1175 = vadd.xlane.f32.xlu1 %v1076_v32  ;;  %1169 = vadd.xlane.f32.xlu0 %v1073_v33  ;;  %v1048_v46 = vmul.f32 %v4210_v0, %v977_v37  ;;  %v1080_v6 = vmul.f32 %v4210_v0, %v1009_v58  ;;  %v1045_v35 = vmul.f32 %v4210_v0, %v974_v13 }
 0x183   : > { %v3375_v40 = vpop.f32.mrb[8].mxu0  ;;  %v3407_v41 = vpop.f32.mrb[8].mxu1  ;;  %v1046_v34 = vmul.f32 %v4210_v0, %v975_v50  ;;  %v4283_v36 = vrot.slane %v398_v17, %v4191_v51  ;;  %v1077_v37 = vmul.f32 %v4210_v0, %v1006_v18  ;;  %v4287_v38 = vrot.slane %v399_v22, %v4191_v51 }
 0x184   : > { %v747_v47 = vpop.f32.mrb[9].mxu0  ;;  %v875_v48 = vpop.f32.mrb[9].mxu1  ;;  %v756_v7 = vadd.f32 %v3375_v40, %v4237_v55  ;;  %v884_v8 = vadd.f32 %v3407_v41, %v4243_v61  ;;  %v4290_v39 = vrot.slane %v400_v23, %v4191_v51  ;;  %v1078_v41 = vmul.f32 %v4210_v0, %v1007_v24 }
 0x185   : > { %v3376_v56 = vpop.f32.mrb[10].mxu0  ;;  %v3408_v57 = vpop.f32.mrb[10].mxu1  ;;  %v748_v9 = vadd.f32 %v747_v47, %v4237_v55  ;;  %v876_v10 = vadd.f32 %v875_v48, %v4243_v61 }
 0x186   : > { %1171 = vadd.xlane.f32.xlu1 %v1074_v43  ;;  %1107 = vadd.xlane.f32.xlu0 %v1042_v45  ;;  %v750_v60 = vpop.f32.mrb[11].mxu0  ;;  %v878_v62 = vpop.f32.mrb[11].mxu1  ;;  %v759_v53 = vadd.f32 %v3376_v56, %v4237_v55  ;;  %v887_v54 = vadd.f32 %v3408_v57, %v4243_v61  ;;  %v980_v25 = vmax.f32 %v756_v7, 0.0  ;;  %v1012_v26 = vmax.f32 %v884_v8, 0.0 }
 0x187   : > { %v751_v14 = vadd.f32 %v750_v60, %v4237_v55  ;;  %v879_v52 = vadd.f32 %v878_v62, %v4243_v61  ;;  %v978_v29 = vmax.f32 %v748_v9, 0.0  ;;  %v1010_v31 = vmax.f32 %v876_v10, 0.0 }
 0x188   : > { %v981_v30 = vmax.f32 %v759_v53, 0.0  ;;  %v1013_v32 = vmax.f32 %v887_v54, 0.0  ;;  %v1051_v43 = vmul.f32 %v4210_v0, %v980_v25  ;;  %v1083_v45 = vmul.f32 %v4210_v0, %v1012_v26 }
 0x189   : > { %v979_v33 = vmax.f32 %v751_v14, 0.0  ;;  %v1011_v40 = vmax.f32 %v879_v52, 0.0  ;;  %v4298_v49 = vmul.f32 %v4210_v0, %v978_v29  ;;  %v4301_v56 = vmul.f32 %v4210_v0, %v1010_v31 }
 0x18a   : > { %1119 = vadd.xlane.f32.xlu1 %v1048_v46  ;;  %1117 = vadd.xlane.f32.xlu0 %v1047_v59  ;;  %v1052_v47 = vmul.f32 %v4210_v0, %v981_v30  ;;  %v1084_v48 = vmul.f32 %v4210_v0, %v1013_v32 }
 0x18b   : > { %v3379_v11 = vpop.f32.mrb[12].mxu0  ;;  %v3411_v12 = vpop.f32.mrb[12].mxu1  ;;  %v4307_v59 = vmul.f32 %v4210_v0, %v979_v33  ;;  %v4336_v52 = vmul.f32 %v4210_v0, %v1011_v40 }
 0x18c   : > { %v4260_v15 = vpop.f32.mrb[13].mxu0  ;;  %v4262_v16 = vpop.f32.mrb[13].mxu1  ;;  %v4304_v46 = vadd.f32 %v3379_v11, %v4237_v55  ;;  %v4315_v3 = vadd.f32 %v3411_v12, %v4243_v61 }
 0x18d   : > { %v3380_v19 = vpop.f32.mrb[14].mxu0  ;;  %v4266_v20 = vpop.f32.mrb[14].mxu1  ;;  %v4347_v32 = vadd.f32 %v4260_v15, %v4237_v55 }
 0x18e   : > { %1183 = vadd.xlane.f32.xlu1 %v1080_v6  ;;  %1181 = vadd.xlane.f32.xlu0 %v1079_v4  ;;  %v4276_v27 = vpop.f32.mrb[15].mxu0  ;;  %v4278_v28 = vpop.f32.mrb[15].mxu1  ;;  %v4312_v2 = vadd.f32 %v3380_v19, %v4237_v55  ;;  %v984_v31 = vmax.f32 %v4304_v46, 0.0  ;;  %v1016_v40 = vmax.f32 %v4315_v3, 0.0 }
 0x18f   : > { %v4365_v46 = vadd.f32 %v4276_v27, %v4237_v55 }
 0x192   : > { %1115 = vadd.xlane.f32.xlu1 %v1046_v34  ;;  %1113 = vadd.xlane.f32.xlu0 %v1045_v35 }
 0x193   : > { %v3383_v57 = vpop.f32.mrb[16].mxu0  ;;  %v3415_v58 = vpop.f32.mrb[16].mxu1 }
 0x194   : > { %v788_v60 = vadd.f32 %v3383_v57, %v4269_v21  ;;  %v779_v62 = vpop.f32.mrb[17].mxu0  ;;  %v916_v63 = vadd.f32 %v3415_v58, %v4283_v36  ;;  %v907_v1 = vpop.f32.mrb[17].mxu1  ;;  %v985_v58 = vmax.f32 %v4312_v2, 0.0 }
 0x195   : > { %v780_v4 = vadd.f32 %v779_v62, %v4269_v21  ;;  %v3384_v5 = vpop.f32.mrb[18].mxu0  ;;  %v908_v6 = vadd.f32 %v907_v1, %v4283_v36  ;;  %v3416_v7 = vpop.f32.mrb[18].mxu1 }
 0x196   : > { %1179 = vadd.xlane.f32.xlu1 %v1078_v41  ;;  %1177 = vadd.xlane.f32.xlu0 %v1077_v37  ;;  %v988_v8 = vmax.f32 %v788_v60, 0.0  ;;  %v791_v9 = vadd.f32 %v3384_v5, %v4269_v21  ;;  %v782_v53 = vpop.f32.mrb[19].mxu0  ;;  %v1020_v10 = vmax.f32 %v916_v63, 0.0  ;;  %v919_v54 = vadd.f32 %v3416_v7, %v4283_v36  ;;  %v910_v11 = vpop.f32.mrb[19].mxu1 }
 0x197   : > { %v986_v13 = vmax.f32 %v780_v4, 0.0  ;;  %v783_v12 = vadd.f32 %v782_v53, %v4269_v21  ;;  %v1018_v50 = vmax.f32 %v908_v6, 0.0  ;;  %v911_v14 = vadd.f32 %v910_v11, %v4283_v36 }
 0x198   : > { %v989_v17 = vmax.f32 %v791_v9, 0.0  ;;  %v1021_v18 = vmax.f32 %v919_v54, 0.0  ;;  %v4324_v19 = vmul.f32 %v4210_v0, %v988_v8  ;;  %v4327_v22 = vmul.f32 %v4210_v0, %v1020_v10 }
 0x199   : > { %v987_v23 = vmax.f32 %v783_v12, 0.0  ;;  %v1019_v24 = vmax.f32 %v911_v14, 0.0  ;;  %v4330_v25 = vmul.f32 %v4210_v0, %v986_v13  ;;  %v4333_v26 = vmul.f32 %v4210_v0, %v1018_v50 }
 0x19a   : > { %1127 = vadd.xlane.f32.xlu1 %v1052_v47  ;;  %1125 = vadd.xlane.f32.xlu0 %v1051_v43  ;;  %v4339_v29 = vmul.f32 %v4210_v0, %v989_v17  ;;  %v4342_v30 = vmul.f32 %v4210_v0, %v1021_v18  ;;  %v4358_v41 = vadd.f32 %v4266_v20, %v4243_v61 }
 0x19b   : > { %v3387_v33 = vpop.f32.mrb[20].mxu0  ;;  %v4350_v34 = vmul.f32 %v4210_v0, %v987_v23  ;;  %v3419_v35 = vpop.f32.mrb[20].mxu1  ;;  %v4353_v37 = vmul.f32 %v4210_v0, %v1019_v24  ;;  %v4401_v17 = vadd.f32 %v4278_v28, %v4243_v61  ;;  %v1055_v23 = vmul.f32 %v4210_v0, %v984_v31 }
 0x19c   : > { %v804_v43 = vadd.f32 %v3387_v33, %v4269_v21  ;;  %v795_v47 = vpop.f32.mrb[21].mxu0  ;;  %v932_v15 = vadd.f32 %v3419_v35, %v4283_v36  ;;  %v923_v57 = vpop.f32.mrb[21].mxu1  ;;  %v1017_v14 = vmax.f32 %v4358_v41, 0.0  ;;  %v1087_v24 = vmul.f32 %v4210_v0, %v1016_v40 }
 0x19d   : > { %v796_v60 = vadd.f32 %v795_v47, %v4269_v21  ;;  %v3388_v62 = vpop.f32.mrb[22].mxu0  ;;  %v924_v63 = vadd.f32 %v923_v57, %v4283_v36  ;;  %v3420_v1 = vpop.f32.mrb[22].mxu1  ;;  %v1056_v28 = vmul.f32 %v4210_v0, %v985_v58 }
 0x19e   : > { %1191 = vadd.xlane.f32.xlu1 %v1084_v48  ;;  %1189 = vadd.xlane.f32.xlu0 %v1083_v45  ;;  %v992_v20 = vmax.f32 %v804_v43, 0.0  ;;  %v807_v3 = vadd.f32 %v3388_v62, %v4269_v21  ;;  %v798_v4 = vpop.f32.mrb[23].mxu0  ;;  %v1024_v5 = vmax.f32 %v932_v15, 0.0  ;;  %v935_v6 = vadd.f32 %v3420_v1, %v4283_v36  ;;  %v926_v2 = vpop.f32.mrb[23].mxu1 }
 0x19f   : > { %v990_v7 = vmax.f32 %v796_v60, 0.0  ;;  %v799_v55 = vadd.f32 %v798_v4, %v4269_v21  ;;  %v1022_v27 = vmax.f32 %v924_v63, 0.0  ;;  %v927_v8 = vadd.f32 %v926_v2, %v4283_v36 }
 0x1a0   : > { %v993_v9 = vmax.f32 %v807_v3, 0.0  ;;  %v1025_v53 = vmax.f32 %v935_v6, 0.0  ;;  %v4374_v10 = vmul.f32 %v4210_v0, %v992_v20  ;;  %v4377_v45 = vmul.f32 %v4210_v0, %v1024_v5 }
 0x1a1   : > { %v991_v48 = vmax.f32 %v799_v55, 0.0  ;;  %v1023_v54 = vmax.f32 %v927_v8, 0.0  ;;  %v4380_v11 = vmul.f32 %v4210_v0, %v990_v7  ;;  %v4383_v13 = vmul.f32 %v4210_v0, %v1022_v27 }
 0x1a2   : > { %v982_v21 = vmax.f32 %v4347_v32, 0.0  ;;  %1123 = vadd.xlane.f32.xlu1 %v4307_v59  ;;  %1121 = vadd.xlane.f32.xlu0 %v4298_v49  ;;  %v4390_v36 = vadd.f32 %v4262_v16, %v4243_v61  ;;  %v4393_v12 = vmul.f32 %v4210_v0, %v993_v9  ;;  %v4396_v50 = vmul.f32 %v4210_v0, %v1025_v53 }
 0x1a3   : > { %v3391_v18 = vpop.f32.mrb[24].mxu0  ;;  %v4404_v59 = vmul.f32 %v4210_v0, %v991_v48  ;;  %v3423_v49 = vpop.f32.mrb[24].mxu1  ;;  %v4407_v16 = vmul.f32 %v4210_v0, %v1023_v54  ;;  %v983_v61 = vmax.f32 %v4365_v46, 0.0  ;;  %v1088_v27 = vmul.f32 %v4210_v0, %v1017_v14 }
 0x1a4   : > { %v820_v32 = vadd.f32 %v3391_v18, %v4287_v38  ;;  %v811_v33 = vpop.f32.mrb[25].mxu0  ;;  %v948_v35 = vadd.f32 %v3423_v49, %v4290_v39  ;;  %v939_v41 = vpop.f32.mrb[25].mxu1  ;;  %v1014_v49 = vmax.f32 %v4390_v36, 0.0 }
 0x1a5   : > { %v812_v43 = vadd.f32 %v811_v33, %v4287_v38  ;;  %v3392_v47 = vpop.f32.mrb[26].mxu0  ;;  %v940_v15 = vadd.f32 %v939_v41, %v4290_v39  ;;  %v3424_v57 = vpop.f32.mrb[26].mxu1  ;;  %v1054_v41 = vmul.f32 %v4210_v0, %v983_v61 }
 0x1a6   : > { %1187 = vadd.xlane.f32.xlu1 %v4336_v52  ;;  %1185 = vadd.xlane.f32.xlu0 %v4301_v56  ;;  %v996_v31 = vmax.f32 %v820_v32, 0.0  ;;  %v823_v40 = vadd.f32 %v3392_v47, %v4287_v38  ;;  %v814_v60 = vpop.f32.mrb[27].mxu0  ;;  %v1028_v62 = vmax.f32 %v948_v35, 0.0  ;;  %v951_v63 = vadd.f32 %v3424_v57, %v4290_v39  ;;  %v942_v46 = vpop.f32.mrb[27].mxu1 }
 0x1a7   : > { %v994_v1 = vmax.f32 %v812_v43, 0.0  ;;  %v815_v58 = vadd.f32 %v814_v60, %v4287_v38  ;;  %v1026_v20 = vmax.f32 %v940_v15, 0.0  ;;  %v943_v3 = vadd.f32 %v942_v46, %v4290_v39 }
 0x1a8   : > { %v997_v4 = vmax.f32 %v823_v40, 0.0  ;;  %v1029_v5 = vmax.f32 %v951_v63, 0.0  ;;  %v4424_v52 = vmul.f32 %v4210_v0, %v996_v31  ;;  %v4427_v56 = vmul.f32 %v4210_v0, %v1028_v62 }
 0x1a9   : > { %v995_v6 = vmax.f32 %v815_v58, 0.0  ;;  %v1027_v2 = vmax.f32 %v943_v3, 0.0  ;;  %v4430_v7 = vmul.f32 %v4210_v0, %v994_v1  ;;  %v4433_v55 = vmul.f32 %v4210_v0, %v1026_v20 }
 0x1aa   : > { %1135 = vadd.xlane.f32.xlu1 %v1056_v28  ;;  %1133 = vadd.xlane.f32.xlu0 %v1055_v23  ;;  %v4437_v8 = vmul.f32 %v4210_v0, %v997_v4  ;;  %v4440_v9 = vmul.f32 %v4210_v0, %v1029_v5  ;;  %v1015_v23 = vmax.f32 %v4401_v17, 0.0  ;;  %v1053_v28 = vmul.f32 %v4210_v0, %v982_v21 }
 0x1ab   : > { %v3395_v53 = vpop.f32.mrb[28].mxu0  ;;  %v4443_v48 = vmul.f32 %v4210_v0, %v995_v6  ;;  %v3427_v54 = vpop.f32.mrb[28].mxu1  ;;  %v4446_v18 = vmul.f32 %v4210_v0, %v1027_v2 }
 0x1ac   : > { %v836_v14 = vadd.f32 %v3395_v53, %v4287_v38  ;;  %v827_v32 = vpop.f32.mrb[29].mxu0  ;;  %v964_v33 = vadd.f32 %v3427_v54, %v4290_v39  ;;  %v955_v35 = vpop.f32.mrb[29].mxu1  ;;  %v1086_v53 = vmul.f32 %v4210_v0, %v1015_v23  ;;  %v1085_v54 = vmul.f32 %v4210_v0, %v1014_v49 }
 0x1ad   : > { %v828_v43 = vadd.f32 %v827_v32, %v4287_v38  ;;  %v3396_v47 = vpop.f32.mrb[30].mxu0  ;;  %v956_v15 = vadd.f32 %v955_v35, %v4290_v39  ;;  %v3428_v57 = vpop.f32.mrb[30].mxu1 }
 0x1ae   : > { %1199 = vadd.xlane.f32.xlu1 %v1088_v27  ;;  %1197 = vadd.xlane.f32.xlu0 %v1087_v24  ;;  %v1000_v36 = vmax.f32 %v836_v14, 0.0  ;;  %v839_v17 = vadd.f32 %v3396_v47, %v4287_v38  ;;  %v830_v31 = vpop.f32.mrb[31].mxu0  ;;  %v1032_v40 = vmax.f32 %v964_v33, 0.0  ;;  %v967_v60 = vadd.f32 %v3428_v57, %v4290_v39  ;;  %v958_v62 = vpop.f32.mrb[31].mxu1 }
 0x1af   : > { %v998_v63 = vmax.f32 %v828_v43, 0.0  ;;  %v831_v61 = vadd.f32 %v830_v31, %v4287_v38  ;;  %v1030_v21 = vmax.f32 %v956_v15, 0.0  ;;  %v959_v46 = vadd.f32 %v958_v62, %v4290_v39 }
 0x1b0   : > { %v1001_v1 = vmax.f32 %v839_v17, 0.0  ;;  %v1033_v58 = vmax.f32 %v967_v60, 0.0  ;;  %v1071_v20 = vmul.f32 %v4210_v0, %v1000_v36  ;;  %v1103_v24 = vmul.f32 %v4210_v0, %v1032_v40 }
 0x1b1   : > { %v999_v3 = vmax.f32 %v831_v61, 0.0  ;;  %v1031_v4 = vmax.f32 %v959_v46, 0.0  ;;  %v1069_v5 = vmul.f32 %v4210_v0, %v998_v63  ;;  %v1101_v6 = vmul.f32 %v4210_v0, %v1030_v21 }
 0x1b2   : > { %1131 = vadd.xlane.f32.xlu1 %v1054_v41  ;;  %1129 = vadd.xlane.f32.xlu0 %v1053_v28  ;;  %v1072_v2 = vmul.f32 %v4210_v0, %v1001_v1  ;;  %v1104_v38 = vmul.f32 %v4210_v0, %v1033_v58  ;;  %v1298_v40 = vand.u32 127, %v356_v42 }
 0x1b3   : > { %v1070_v39 = vmul.f32 %v4210_v0, %v999_v3  ;;  %v1102_v27 = vmul.f32 %v4210_v0, %v1031_v4 }
 0x1b4   : > { %v1303_v60 = vadd.s32 4294967288, %v1298_v40  ;;  %v1310_v1 = vadd.s32 4294967280, %v1298_v40  ;;  %v4587_v58 = vsub.s32 %v1298_v40, %v4179_v44 }
 0x1b6   : > { %1195 = vadd.xlane.f32.xlu1 %v1086_v53  ;;  %1193 = vadd.xlane.f32.xlu0 %v1085_v54  ;;  %v4580_v61 = vsub.s32 %v1303_v60, %v4179_v44  ;;  %5841 = vst [vmem:[#allocation41_spill] sm:$0xff] %v4587_v58 }
 0x1b8   : > { %5840 = vst [vmem:[#allocation40_spill] sm:$0xff] %v4580_v61 }
 0x1ba   : > { %1143 = vadd.xlane.f32.xlu1 %v4339_v29  ;;  %1141 = vadd.xlane.f32.xlu0 %v4324_v19 }
 0x1be   : > { %1207 = vadd.xlane.f32.xlu1 %v4342_v30  ;;  %1205 = vadd.xlane.f32.xlu0 %v4327_v22 }
 0x1c2   : > { %1139 = vadd.xlane.f32.xlu1 %v4350_v34  ;;  %1137 = vadd.xlane.f32.xlu0 %v4330_v25 }
 0x1c6   : > { %1203 = vadd.xlane.f32.xlu1 %v4353_v37  ;;  %1201 = vadd.xlane.f32.xlu0 %v4333_v26 }
 0x1ca   : > { %1151 = vadd.xlane.f32.xlu1 %v4393_v12  ;;  %1149 = vadd.xlane.f32.xlu0 %v4374_v10 }
 0x1ce   : > { %1215 = vadd.xlane.f32.xlu1 %v4396_v50  ;;  %1213 = vadd.xlane.f32.xlu0 %v4377_v45 }
 0x1d2   : > { %1147 = vadd.xlane.f32.xlu1 %v4404_v59  ;;  %1145 = vadd.xlane.f32.xlu0 %v4380_v11 }
 0x1d6   : > { %1211 = vadd.xlane.f32.xlu1 %v4407_v16  ;;  %1209 = vadd.xlane.f32.xlu0 %v4383_v13 }
 0x1da   : > { %1159 = vadd.xlane.f32.xlu1 %v4437_v8  ;;  %1157 = vadd.xlane.f32.xlu0 %v4424_v52 }
 0x1de   : > { %1223 = vadd.xlane.f32.xlu1 %v4440_v9  ;;  %1221 = vadd.xlane.f32.xlu0 %v4427_v56 }
 0x1e2   : > { %1155 = vadd.xlane.f32.xlu1 %v4443_v48  ;;  %1153 = vadd.xlane.f32.xlu0 %v4430_v7 }
 0x1e6   : > { %1219 = vadd.xlane.f32.xlu1 %v4446_v18  ;;  %1217 = vadd.xlane.f32.xlu0 %v4433_v55 }
 0x1ea   : > { %1167 = vadd.xlane.f32.xlu1 %v1072_v2  ;;  %1165 = vadd.xlane.f32.xlu0 %v1071_v20  ;;  %v1317_v20 = vadd.s32 4294967272, %v1298_v40  ;;  %v1331_v2 = vadd.s32 4294967256, %v1298_v40 }
 0x1ee   : > { %1163 = vadd.xlane.f32.xlu1 %v1070_v39  ;;  %1161 = vadd.xlane.f32.xlu0 %v1069_v5  ;;  %v4596_v5 = vsub.s32 %v1310_v1, %v4179_v44  ;;  %v4603_v39 = vsub.s32 %v1317_v20, %v4179_v44  ;;  %v4618_v20 = vsub.s32 %v1331_v2, %v4179_v44 }
 0x1f0   : > { %5842 = vst [vmem:[#allocation42_spill] sm:$0xff] %v4596_v5 }
 0x1f2   : > { %1227 = vadd.xlane.f32.xlu1 %v1102_v27  ;;  %1225 = vadd.xlane.f32.xlu0 %v1101_v6 }
 0x1f6   : > { %1231 = vadd.xlane.f32.xlu1 %v1104_v38  ;;  %1229 = vadd.xlane.f32.xlu0 %v1103_v24  ;;  %v1324_v24 = vadd.s32 4294967264, %v1298_v40 }
 0x1f8   : > { %v4607_v53 = vsub.s32 %v1324_v24, %v4179_v44 }
 0x207   : > { %v4494_v0 = vpop.xlane.xlu0 %1173  ;;  %v4496_v19 = vpop.xlane.xlu1 %1109 }
 0x208   : > { %5814 = vst [vmem:[#allocation14_spill] sm:$0xff] %v4494_v0  ;;  %5815 = vst [vmem:[#allocation15_spill] sm:$0xff] %v4496_v19  ;;  %v1314_v1 = vrot.slane %v4496_v19, %v4596_v5  ;;  %v1481_v19 = vrot.slane %v4494_v0, %v4596_v5 }
 0x20b   : > { %v4498_v22 = vpop.xlane.xlu1 %1111  ;;  %v4500_v25 = vpop.xlane.xlu0 %1105 }
 0x20c   : > { %5816 = vst [vmem:[#allocation16_spill] sm:$0xff] %v4498_v22  ;;  %5817 = vst [vmem:[#allocation17_spill] sm:$0xff] %v4500_v25  ;;  %v1302_v6 = vrot.slane %v4500_v25, %v4587_v58 }
 0x20f   : > { %v4502_v26 = vpop.xlane.xlu1 %1175  ;;  %v4504_v29 = vpop.xlane.xlu0 %1169 }
 0x210   : > { %5818 = vst [vmem:[#allocation18_spill] sm:$0xff] %v4502_v26  ;;  %5819 = vst [vmem:[#allocation19_spill] sm:$0xff] %v4504_v29  ;;  %v1472_v25 = vrot.slane %v4504_v29, %v4587_v58 }
 0x213   : > { %v4506_v30 = vpop.xlane.xlu1 %1171  ;;  %v4508_v34 = vpop.xlane.xlu0 %1107 }
 0x214   : > { %5820 = vst [vmem:[#allocation20_spill] sm:$0xff] %v4506_v30  ;;  %5821 = vst [vmem:[#allocation21_spill] sm:$0xff] %v4508_v34  ;;  %v1307_v42 = vrot.slane %v4508_v34, %v4580_v61  ;;  %v1476_v38 = vrot.slane %v4506_v30, %v4580_v61  ;;  %v1345_v30 = vadd.s32 4294967240, %v1298_v40  ;;  %v1338_v34 = vadd.s32 4294967248, %v1298_v40 }
 0x215   : > { %v1321_v40 = vrot.slane %v4498_v22, %v4603_v39 }
 0x216   : > { %v1309_v27 = vsel %vm1308_vm0, %v1307_v42, %v1302_v6  ;;  %v1477_v6 = vsel %vm1308_vm0, %v1476_v38, %v1472_v25  ;;  %v4640_v25 = vsub.s32 %v1338_v34, %v4179_v44 }
 0x217   : > { %v4510_v37 = vpop.xlane.xlu1 %1119  ;;  %v4512_v10 = vpop.xlane.xlu0 %1117  ;;  %v1316_v51 = vsel %vm1315_vm1, %v1314_v1, %v1309_v27  ;;  %v1482_v38 = vsel %vm1315_vm1, %v1481_v19, %v1477_v6  ;;  %v1486_v19 = vrot.slane %v4502_v26, %v4603_v39 }
 0x218   : > { %5822 = vst [vmem:[#allocation22_spill] sm:$0xff] %v4510_v37  ;;  %5823 = vst [vmem:[#allocation23_spill] sm:$0xff] %v4512_v10  ;;  %v1323_v1 = vsel %vm1322_vm2, %v1321_v40, %v1316_v51 }
 0x21b   : > { %v4514_v45 = vpop.xlane.xlu1 %1183  ;;  %v4516_v11 = vpop.xlane.xlu0 %1181 }
 0x21c   : > { %5824 = vst [vmem:[#allocation24_spill] sm:$0xff] %v4516_v11 }
 0x21f   : > { %v4518_v13 = vpop.xlane.xlu1 %1115  ;;  %v4520_v12 = vpop.xlane.xlu0 %1113 }
 0x220   : > { %5825 = vst [vmem:[#allocation25_spill] sm:$0xff] %v4518_v13  ;;  %5826 = vst [vmem:[#allocation26_spill] sm:$0xff] %v4520_v12  ;;  %v1328_v2 = vrot.slane %v4520_v12, %v4607_v53  ;;  %v1335_v27 = vrot.slane %v4518_v13, %v4618_v20 }
 0x222   : > { %v1330_v6 = vsel %vm1329_vm3, %v1328_v2, %v1323_v1  ;;  %v1342_v1 = vrot.slane %v4512_v10, %v4640_v25 }
 0x223   : > { %v4522_v50 = vpop.xlane.xlu1 %1179  ;;  %v4524_v59 = vpop.xlane.xlu0 %1177 }
 0x224   : > { %5827 = vst [vmem:[#allocation27_spill] sm:$0xff] %v4522_v50  ;;  %5828 = vst [vmem:[#allocation28_spill] sm:$0xff] %v4524_v59  ;;  %v1491_v12 = vrot.slane %v4524_v59, %v4607_v53  ;;  %v1496_v13 = vrot.slane %v4522_v50, %v4618_v20 }
 0x227   : > { %v4526_v16 = vpop.xlane.xlu1 %1127  ;;  %v4528_v52 = vpop.xlane.xlu0 %1125 }
 0x228   : > { %v1369_v26 = vrot.slane %v4526_v16, %v4603_v39 }
 0x22b   : > { %v4530_v56 = vpop.xlane.xlu1 %1191  ;;  %v4532_v7 = vpop.xlane.xlu0 %1189 }
 0x22c   : > { %5829 = vst [vmem:[#allocation29_spill] sm:$0xff] %v4530_v56  ;;  %5830 = vst [vmem:[#allocation30_spill] sm:$0xff] %v4532_v7 }
 0x22f   : > { %v4534_v55 = vpop.xlane.xlu1 %1123  ;;  %v4536_v8 = vpop.xlane.xlu0 %1121 }
 0x230   : > { %5831 = vst [vmem:[#allocation31_spill] sm:$0xff] %v4534_v55  ;;  %5832 = vst [vmem:[#allocation32_spill] sm:$0xff] %v4536_v8  ;;  %v1359_v42 = vrot.slane %v4534_v55, %v4580_v61  ;;  %v1355_v24 = vrot.slane %v4536_v8, %v4587_v58  ;;  %v4637_v8 = vsub.s32 %v1345_v30, %v4179_v44 }
 0x231   : > { %v1364_v30 = vrot.slane %v4528_v52, %v4596_v5 }
 0x232   : > { %v1360_v0 = vsel %vm1308_vm0, %v1359_v42, %v1355_v24  ;;  %v1349_v2 = vrot.slane %v4510_v37, %v4637_v8 }
 0x233   : > { %v4538_v9 = vpop.xlane.xlu1 %1187  ;;  %v4540_v48 = vpop.xlane.xlu0 %1185  ;;  %v1365_v59 = vsel %vm1315_vm1, %v1364_v30, %v1360_v0 }
 0x234   : > { %5833 = vst [vmem:[#allocation33_spill] sm:$0xff] %v4538_v9  ;;  %5834 = vst [vmem:[#allocation34_spill] sm:$0xff] %v4540_v48  ;;  %v1515_v51 = vrot.slane %v4538_v9, %v4580_v61  ;;  %v1511_v42 = vrot.slane %v4540_v48, %v4587_v58  ;;  %v1487_v9 = vsel %vm1322_vm2, %v1486_v19, %v1482_v38 }
 0x235   : > { %v1337_v48 = vsel %vm1336_vm4, %v1335_v27, %v1330_v6  ;;  %v1492_v0 = vsel %vm1329_vm3, %v1491_v12, %v1487_v9  ;;  %v1370_v10 = vsel %vm1322_vm2, %v1369_v26, %v1365_v59  ;;  %v1520_v12 = vrot.slane %v4532_v7, %v4596_v5 }
 0x236   : > { %v1497_v6 = vsel %vm1336_vm4, %v1496_v13, %v1492_v0 }
 0x237   : > { %v4542_v18 = vpop.xlane.xlu1 %1135  ;;  %v4544_v49 = vpop.xlane.xlu0 %1133 }
 0x23b   : > { %v4546_v23 = vpop.xlane.xlu1 %1199  ;;  %v4548_v14 = vpop.xlane.xlu0 %1197 }
 0x23f   : > { %v4550_v32 = vpop.xlane.xlu1 %1131  ;;  %v4552_v33 = vpop.xlane.xlu0 %1129 }
 0x240   : > { %v1379_v37 = vrot.slane %v4550_v32, %v4618_v20 }
 0x243   : > { %v4554_v35 = vpop.xlane.xlu1 %1195  ;;  %v4556_v41 = vpop.xlane.xlu0 %1193 }
 0x244   : > { %5835 = vst [vmem:[#allocation35_spill] sm:$0xff] %v4556_v41 }
 0x247   : > { %v4558_v28 = vpop.xlane.xlu1 %1143  ;;  %v4560_v43 = vpop.xlane.xlu0 %1141 }
 0x248   : > { %v1403_v38 = vrot.slane %v4560_v43, %v4596_v5 }
 0x24b   : > { %v4562_v47 = vpop.xlane.xlu1 %1207  ;;  %v4564_v15 = vpop.xlane.xlu0 %1205 }
 0x24f   : > { %v4566_v57 = vpop.xlane.xlu1 %1139  ;;  %v4568_v36 = vpop.xlane.xlu0 %1137 }
 0x250   : > { %5836 = vst [vmem:[#allocation36_spill] sm:$0xff] %v4566_v57  ;;  %5837 = vst [vmem:[#allocation37_spill] sm:$0xff] %v4568_v36  ;;  %v1398_v34 = vrot.slane %v4566_v57, %v4580_v61  ;;  %v1394_v22 = vrot.slane %v4568_v36, %v4587_v58  ;;  %v1374_v57 = vrot.slane %v4552_v33, %v4607_v53 }
 0x251   : > { %v1516_v36 = vsel %vm1308_vm0, %v1515_v51, %v1511_v42  ;;  %v1344_v42 = vsel %vm1343_vm5, %v1342_v1, %v1337_v48  ;;  %v1384_v1 = vrot.slane %v4544_v49, %v4640_v25 }
 0x252   : > { %v1399_v30 = vsel %vm1308_vm0, %v1398_v34, %v1394_v22  ;;  %v1501_v22 = vrot.slane %v4516_v11, %v4640_v25  ;;  %v1375_v9 = vsel %vm1329_vm3, %v1374_v57, %v1370_v10  ;;  %v1521_v50 = vsel %vm1315_vm1, %v1520_v12, %v1516_v36 }
 0x253   : > { %v4570_v17 = vpop.xlane.xlu1 %1203  ;;  %v4572_v31 = vpop.xlane.xlu0 %1201  ;;  %v1404_v26 = vsel %vm1315_vm1, %v1403_v38, %v1399_v30  ;;  %v1408_v10 = vrot.slane %v4558_v28, %v4603_v39  ;;  %v1380_v57 = vsel %vm1336_vm4, %v1379_v37, %v1375_v9  ;;  %v1530_v30 = vrot.slane %v4556_v41, %v4607_v53 }
 0x254   : > { %5838 = vst [vmem:[#allocation38_spill] sm:$0xff] %v4570_v17  ;;  %5839 = vst [vmem:[#allocation39_spill] sm:$0xff] %v4572_v31  ;;  %v1554_v59 = vrot.slane %v4570_v17, %v4580_v61  ;;  %v1550_v34 = vrot.slane %v4572_v31, %v4587_v58  ;;  %v1525_v36 = vrot.slane %v4530_v56, %v4603_v39 }
 0x255   : > { %v1409_v0 = vsel %vm1322_vm2, %v1408_v10, %v1404_v26  ;;  %v1351_v12 = vsel %vm1350_vm6, %v1349_v2, %v1344_v42  ;;  %v4730_v9 = vsel %vm1343_vm5, %v1501_v22, %v1497_v6  ;;  %v1385_v7 = vsel %vm1343_vm5, %v1384_v1, %v1380_v57 }
 0x256   : > { %v1555_v31 = vsel %vm1308_vm0, %v1554_v59, %v1550_v34  ;;  %v1535_v56 = vrot.slane %v4554_v35, %v4618_v20  ;;  %v1559_v11 = vrot.slane %v4564_v15, %v4596_v5  ;;  %v1545_v42 = vrot.slane %v4546_v23, %v4637_v8 }
 0x257   : > { %v4575_v62 = vpop.xlane.xlu1 %1151  ;;  %v4577_v63 = vpop.xlane.xlu0 %1149  ;;  %v1564_v10 = vrot.slane %v4562_v47, %v4603_v39 }
 0x258   : > { %v1423_v57 = vrot.slane %v4577_v63, %v4640_v25 }
 0x25b   : > { %v4582_v21 = vpop.xlane.xlu1 %1215  ;;  %v4584_v46 = vpop.xlane.xlu0 %1213 }
 0x25f   : > { %v4591_v3 = vpop.xlane.xlu1 %1147  ;;  %v4593_v4 = vpop.xlane.xlu0 %1145 }
 0x260   : > { %v1413_v51 = vrot.slane %v4593_v4, %v4607_v53  ;;  %v1418_v37 = vrot.slane %v4591_v3, %v4618_v20 }
 0x262   : > { %v1414_v41 = vsel %vm1329_vm3, %v1413_v51, %v1409_v0  ;;  %v1560_v51 = vsel %vm1315_vm1, %v1559_v11, %v1555_v31  ;;  %v1428_v31 = vrot.slane %v4575_v62, %v4637_v8 }
 0x263   : > { %v4609_v54 = vpop.xlane.xlu1 %1211  ;;  %v4611_v60 = vpop.xlane.xlu0 %1209  ;;  %v1565_v1 = vsel %vm1322_vm2, %v1564_v10, %v1560_v51 }
 0x267   : > { %v4632_v29 = vpop.xlane.xlu1 %1159  ;;  %v4634_v55 = vpop.xlane.xlu0 %1157 }
 0x26b   : > { %v4662_v24 = vpop.xlane.xlu1 %1223  ;;  %v4664_v40 = vpop.xlane.xlu0 %1221 }
 0x26f   : > { %v4687_v19 = vpop.xlane.xlu1 %1155  ;;  %v4689_v27 = vpop.xlane.xlu0 %1153 }
 0x270   : > { %5843 = vst [vmem:[#allocation43_spill] sm:$0xff] %v4687_v19  ;;  %v1437_v38 = vrot.slane %v4687_v19, %v4580_v61  ;;  %v1433_v17 = vrot.slane %v4689_v27, %v4587_v58  ;;  %v1526_v19 = vsel %vm1322_vm2, %v1525_v36, %v1521_v50  ;;  %v1389_v50 = vrot.slane %v4542_v18, %v4637_v8 }
 0x271   : > { %v1531_v2 = vsel %vm1329_vm3, %v1530_v30, %v1526_v19  ;;  %v1419_v19 = vsel %vm1336_vm4, %v1418_v37, %v1414_v41  ;;  %v1569_v30 = vrot.slane %v4611_v60, %v4607_v53  ;;  %v1447_v37 = vrot.slane %v4632_v29, %v4603_v39 }
 0x272   : > { %v1438_v6 = vsel %vm1308_vm0, %v1437_v38, %v1433_v17  ;;  %v1442_v17 = vrot.slane %v4634_v55, %v4596_v5  ;;  %v1390_v11 = vsel %vm1350_vm6, %v1389_v50, %v1385_v7  ;;  %v1536_v41 = vsel %vm1336_vm4, %v1535_v56, %v1531_v2 }
 0x273   : > { %v4717_v48 = vpop.xlane.xlu1 %1219  ;;  %v4719_v13 = vpop.xlane.xlu0 %1217  ;;  %v1424_v36 = vsel %vm1343_vm5, %v1423_v57, %v1419_v19  ;;  %v1574_v56 = vrot.slane %v4609_v54, %v4618_v20  ;;  %v1598_v7 = vrot.slane %v4664_v40, %v4596_v5  ;;  %v1540_v50 = vrot.slane %v4548_v14, %v4640_v25 }
 0x274   : > { %5844 = vst [vmem:[#allocation44_spill] sm:$0xff] %v4717_v48  ;;  %v1593_v22 = vrot.slane %v4717_v48, %v4580_v61  ;;  %v1589_v26 = vrot.slane %v4719_v13, %v4587_v58  ;;  %v1443_v38 = vsel %vm1315_vm1, %v1442_v17, %v1438_v6  ;;  %v1626_v51 = vsel %vm1625_vm7, %v1390_v11, %v1351_v12 }
 0x275   : > { %v1429_v19 = vsel %vm1350_vm6, %v1428_v31, %v1424_v36  ;;  %v1603_v5 = vrot.slane %v4662_v24, %v4603_v39  ;;  %v1541_v11 = vsel %vm1343_vm5, %v1540_v50, %v1536_v41  ;;  %v1579_v31 = vrot.slane %v4584_v46, %v4640_v25 }
 0x276   : > { %v1594_v0 = vsel %vm1308_vm0, %v1593_v22, %v1589_v26  ;;  %v1570_v22 = vsel %vm1329_vm3, %v1569_v30, %v1565_v1  ;;  %v1448_v26 = vsel %vm1322_vm2, %v1447_v37, %v1443_v38 }
 0x277   : > { %v4746_v59 = vpop.xlane.xlu1 %1167  ;;  %v4748_v34 = vpop.xlane.xlu0 %1165  ;;  %v1599_v17 = vsel %vm1315_vm1, %v1598_v7, %v1594_v0  ;;  %v1575_v36 = vsel %vm1336_vm4, %v1574_v56, %v1570_v22  ;;  %v5845_v56 = vrot.slane %v4514_v45, %v4637_v8 }
 0x278   : > { %v1462_v10 = vrot.slane %v4748_v34, %v4640_v25  ;;  %v1467_v48 = vrot.slane %v4746_v59, %v4637_v8  ;;  %v1604_v7 = vsel %vm1322_vm2, %v1603_v5, %v1599_v17  ;;  %v1546_v5 = vsel %vm1350_vm6, %v1545_v42, %v1541_v11 }
 0x279   : > { %v1507_v50 = vsel %vm1350_vm6, %v5845_v56, %v4730_v9 }
 0x27b   : > { %v4774_v61 = vpop.xlane.xlu1 %1163  ;;  %v4776_v58 = vpop.xlane.xlu0 %1161 }
 0x27c   : > { %v1457_v2 = vrot.slane %v4774_v61, %v4618_v20  ;;  %v1452_v6 = vrot.slane %v4776_v58, %v4607_v53 }
 0x27e   : > { %v1453_v57 = vsel %vm1329_vm3, %v1452_v6, %v1448_v26  ;;  %v1628_v6 = vsel %vm1627_vm8, %v1429_v19, %v1626_v51  ;;  %v1584_v19 = vrot.slane %v4582_v21, %v4637_v8 }
 0x27f   : > { %v1458_v30 = vsel %vm1336_vm4, %v1457_v2, %v1453_v57  ;;  %v4801_v38 = vpop.xlane.xlu1 %1227  ;;  %v4803_v12 = vpop.xlane.xlu0 %1225 }
 0x280   : > { %v1463_v1 = vsel %vm1343_vm5, %v1462_v10, %v1458_v30  ;;  %v1608_v37 = vrot.slane %v4803_v12, %v4607_v53  ;;  %v1613_v0 = vrot.slane %v4801_v38, %v4618_v20 }
 0x281   : > { %v1468_v2 = vsel %vm1350_vm6, %v1467_v48, %v1463_v1  ;;  %v1580_v48 = vsel %vm1343_vm5, %v1579_v31, %v1575_v36 }
 0x282   : > { %v1609_v41 = vsel %vm1329_vm3, %v1608_v37, %v1604_v7  ;;  %v1630_v22 = vsel %vm1629_vm9, %v1468_v2, %v1628_v6  ;;  %v1585_v42 = vsel %vm1350_vm6, %v1584_v19, %v1580_v48  ;;  %v3918_v7 = vmov 0   ;;  %v5846_v6 = vld [vmem:[#allocation13_spill] sm:$0xff]  ;;  %v5849_v19 = vld [vmem:[#allocation15_spill] sm:$0xff] }
 0x283   : > { %v4824_v26 = vpop.xlane.xlu1 %1231  ;;  %v4826_v10 = vpop.xlane.xlu0 %1229  ;;  %v1632_v51 = vsel %vm1631_vm10, %v1507_v50, %v1630_v22  ;;  %v1614_v30 = vsel %vm1336_vm4, %v1613_v0, %v1609_v41  ;;  %3512 = vset.pattern.permute.xlu0 %v3918_v7  ;;  %3511 = vset.pattern.permute.xlu1 %v3918_v7  ;;  %v5746_v0 = vsub.s32 1, %v4179_v44  ;;  %v5847_v50 = vld [vmem:[#allocation21_spill] sm:$0xff] }
 0x284   : > { %v1623_v17 = vrot.slane %v4824_v26, %v4637_v8  ;;  %v1618_v9 = vrot.slane %v4826_v10, %v4640_v25  ;;  %v1634_v57 = vsel %vm1633_vm11, %v1546_v5, %v1632_v51  ;;  %v5848_v5 = vld [vmem:[#allocation17_spill] sm:$0xff] }
 0x285   : > { %v1636_v36 = vsel %vm1635_vm12, %v1585_v42, %v1634_v57 }
 0x286   : > { %v1619_v11 = vsel %vm1343_vm5, %v1618_v9, %v1614_v30  ;;  %v5745_v30 = vsub.s32 2, %v4179_v44 }
 0x287   : > { %v1624_v31 = vsel %vm1350_vm6, %v1623_v17, %v1619_v11 }
 0x288   : > { %v1638_v1 = vsel %vm1637_vm13, %v1624_v31, %v1636_v36  ;;  %v5850_v36 = vld [vmem:[#allocation16_spill] sm:$0xff] }
 0x289   : > { %v1641_v37 = vsel %vm1640_vm14, %v1638_v1, -inf }
 0x28a   : > { %1642 = vmax.xlane.f32.xlu0 %v1641_v37 }
 0x317   : > { %v4846_v2 = vpop.xlane.xlu0 %1642 }
 0x318   : > { %v1648_v41 = vrot.slane %v4846_v2, %v5846_v6  ;;  %v4853_v56 = vrot.slane %v4846_v2, %v5746_v0  ;;  %v4867_v37 = vrot.slane %v4846_v2, %v5745_v30  ;;  %v5750_v0 = vsub.s32 5, %v4179_v44 }
 0x31a   : > { %v1686_v22 = vsub.f32 %v5847_v50, %v1648_v41  ;;  %v1685_v48 = vsub.f32 %v5848_v5, %v1648_v41  ;;  %v1695_v51 = vsub.f32 %v4528_v52, %v4853_v56  ;;  %v1687_v17 = vsub.f32 %v5849_v19, %v1648_v41 }
 0x31b   : > { %v1697_v11 = vsub.f32 %v4552_v33, %v4853_v56  ;;  %v1688_v1 = vsub.f32 %v5850_v36, %v1648_v41  ;;  %v1699_v7 = vsub.f32 %v4544_v49, %v4853_v56  ;;  %v5854_v36 = vld [vmem:[#allocation23_spill] sm:$0xff] }
 0x31c   : > { %v1751_v9 = vmul.f32 1.442695, %v1686_v22  ;;  %v1749_v57 = vmul.f32 1.442695, %v1685_v48  ;;  %v1769_v42 = vmul.f32 1.442695, %v1695_v51 }
 0x31d   : > { %v1753_v31 = vmul.f32 1.442695, %v1687_v17  ;;  %v1773_v52 = vmul.f32 1.442695, %v1697_v11  ;;  %v1755_v50 = vmul.f32 1.442695, %v1688_v1  ;;  %v1703_v11 = vsub.f32 %v4560_v43, %v4867_v37 }
 0x31e   : > { %3586 = vpow2.f32 %v1751_v9  ;;  %v5851_v22 = vld [vmem:[#allocation26_spill] sm:$0xff]  ;;  %v1777_v33 = vmul.f32 1.442695, %v1699_v7  ;;  %v5852_v48 = vld [vmem:[#allocation37_spill] sm:$0xff]  ;;  %v1691_v1 = vsub.f32 %v5854_v36, %v1648_v41 }
 0x31f   : > { %3588 = vpow2.f32 %v1749_v57  ;;  %v1689_v5 = vsub.f32 %v5851_v22, %v1648_v41  ;;  %v1701_v51 = vsub.f32 %v5852_v48, %v4867_v37  ;;  %v5853_v17 = vld [vmem:[#allocation25_spill] sm:$0xff]  ;;  %v1785_v22 = vmul.f32 1.442695, %v1703_v11 }
 0x320   : > { %3590 = vpow2.f32 %v1769_v42  ;;  %v1690_v9 = vsub.f32 %v5853_v17, %v1648_v41  ;;  %v1761_v43 = vmul.f32 1.442695, %v1691_v1 }
 0x321   : > { %3592 = vpow2.f32 %v1753_v31  ;;  %v1757_v19 = vmul.f32 1.442695, %v1689_v5  ;;  %v1781_v49 = vmul.f32 1.442695, %v1701_v51  ;;  %v1705_v5 = vsub.f32 %v4593_v4, %v4867_v37 }
 0x322   : > { %3594 = vpow2.f32 %v1773_v52  ;;  %v1759_v31 = vmul.f32 1.442695, %v1690_v9  ;;  %v1707_v4 = vsub.f32 %v4577_v63, %v4867_v37 }
 0x323   : > { %3596 = vpow2.f32 %v1755_v50  ;;  %v5743_v50 = vsub.s32 3, %v4179_v44  ;;  %v1789_v9 = vmul.f32 1.442695, %v1705_v5  ;;  %v5859_v5 = vld [vmem:[#allocation31_spill] sm:$0xff] }
 0x324   : > { %3598 = vpow2.f32 %v1777_v33  ;;  %v5856_v33 = vld [vmem:[#allocation22_spill] sm:$0xff]  ;;  %v1793_v1 = vmul.f32 1.442695, %v1707_v4  ;;  %v1696_v4 = vsub.f32 %v4526_v16, %v4853_v56  ;;  %v1698_v16 = vsub.f32 %v4550_v32, %v4853_v56 }
 0x325   : > { %3600 = vpow2.f32 %v1757_v19  ;;  %v1692_v48 = vsub.f32 %v5856_v33, %v1648_v41  ;;  %v4902_v17 = vrot.slane %v4846_v2, %v5743_v50 }
 0x326   : > { %3602 = vpow2.f32 %v1781_v49  ;;  %v5858_v49 = vld [vmem:[#allocation32_spill] sm:$0xff]  ;;  %v1775_v32 = vmul.f32 1.442695, %v1698_v16 }
 0x327   : > { %3604 = vpow2.f32 %v1759_v31  ;;  %v1763_v41 = vmul.f32 1.442695, %v1692_v48  ;;  %v1693_v11 = vsub.f32 %v5858_v49, %v4853_v56 }
 0x328   : > { %v4875_v57 = vpop.eup %3586  ;;  %3606 = vpow2.f32 %v1785_v22  ;;  %v1709_v22 = vsub.f32 %v4689_v27, %v4902_v17 }
 0x329   : > { %v4877_v42 = vpop.eup %3588  ;;  %1945 = vperm.xlu0 %3512, %v4875_v57   ;;  %3608 = vpow2.f32 %v1761_v43  ;;  %v1765_v63 = vmul.f32 1.442695, %v1693_v11  ;;  %v1694_v43 = vsub.f32 %v5859_v5, %v4853_v56  ;;  %v5744_v5 = vsub.s32 4, %v4179_v44 }
 0x32a   : > { %1942 = vperm.xlu1 %3511, %v4877_v42   ;;  %v4884_v52 = vpop.eup %3590  ;;  %3610 = vpow2.f32 %v1789_v9  ;;  %v1797_v49 = vmul.f32 1.442695, %v1709_v22  ;;  %v1711_v9 = vsub.f32 %v4634_v55, %v4902_v17  ;;  %v1713_v55 = vsub.f32 %v4776_v58, %v4902_v17 }
 0x32b   : > { %5855 = vst [vmem:[#allocation13_spill] sm:$0xff] %v4884_v52  ;;  %v4886_v7 = vpop.eup %3592  ;;  %3612 = vpow2.f32 %v1763_v41  ;;  %v1767_v27 = vmul.f32 1.442695, %v1694_v43  ;;  %v1771_v22 = vmul.f32 1.442695, %v1696_v4  ;;  %v4948_v50 = vrot.slane %v4846_v2, %v5744_v5 }
 0x32c   : > { %v4894_v51 = vpop.eup %3594  ;;  %3614 = vpow2.f32 %v1793_v1  ;;  %v1801_v1 = vmul.f32 1.442695, %v1711_v9  ;;  %v1805_v58 = vmul.f32 1.442695, %v1713_v55  ;;  %v1700_v9 = vsub.f32 %v4542_v18, %v4853_v56 }
 0x32d   : > { %1972 = vperm.xlu0 %3512, %v4884_v52   ;;  %5857 = vst [vmem:[#allocation21_spill] sm:$0xff] %v4894_v51  ;;  %v4896_v19 = vpop.eup %3596  ;;  %3616 = vpow2.f32 %v1765_v63 }
 0x32e   : > { %1948 = vperm.xlu1 %3511, %v4886_v7   ;;  %v4909_v31 = vpop.eup %3598  ;;  %3618 = vpow2.f32 %v1797_v49  ;;  %v1715_v49 = vsub.f32 %v4748_v34, %v4902_v17  ;;  %v1779_v34 = vmul.f32 1.442695, %v1700_v9 }
 0x32f   : > { %v4911_v36 = vpop.eup %3600  ;;  %3620 = vpow2.f32 %v1767_v27 }
 0x330   : > { %v4919_v33 = vpop.eup %3602  ;;  %3622 = vpow2.f32 %v1801_v1  ;;  %v1809_v5 = vmul.f32 1.442695, %v1715_v49  ;;  %v5860_v1 = vld [vmem:[#allocation19_spill] sm:$0xff] }
 0x331   : > { %1978 = vperm.xlu0 %3512, %v4894_v51   ;;  %v4921_v48 = vpop.eup %3604  ;;  %3624 = vpow2.f32 %v1771_v22  ;;  %v1717_v55 = vsub.f32 %v5860_v1, %v4948_v50  ;;  %v5861_v22 = vld [vmem:[#allocation36_spill] sm:$0xff] }
 0x332   : > { %1951 = vperm.xlu1 %3511, %v4896_v19   ;;  %v4929_v41 = vpop.eup %3606  ;;  %3626 = vpow2.f32 %v1805_v58  ;;  %v1702_v16 = vsub.f32 %v5861_v22, %v4867_v37  ;;  %v5863_v58 = vld [vmem:[#allocation14_spill] sm:$0xff] }
 0x333   : > { %v4931_v11 = vpop.eup %3608  ;;  %3628 = vpow2.f32 %v1775_v32  ;;  %v1813_v56 = vmul.f32 1.442695, %v1717_v55  ;;  %v1719_v49 = vsub.f32 %v5863_v58, %v4948_v50  ;;  %v1704_v32 = vsub.f32 %v4558_v28, %v4867_v37  ;;  %v5865_v55 = vld [vmem:[#allocation28_spill] sm:$0xff] }
 0x334   : > { %v4940_v63 = vpop.eup %3610  ;;  %3630 = vpow2.f32 %v1809_v5  ;;  %v1783_v1 = vmul.f32 1.442695, %v1702_v16  ;;  %v1721_v58 = vsub.f32 %v5865_v55, %v4948_v50  ;;  %v1706_v28 = vsub.f32 %v4591_v3, %v4867_v37 }
 0x335   : > { %1984 = vperm.xlu0 %3512, %v4909_v31   ;;  %v4942_v43 = vpop.eup %3612  ;;  %3632 = vpow2.f32 %v1779_v34  ;;  %v1817_v5 = vmul.f32 1.442695, %v1719_v49  ;;  %v1787_v34 = vmul.f32 1.442695, %v1704_v32  ;;  %v5868_v49 = vld [vmem:[#allocation24_spill] sm:$0xff]  ;;  %v1708_v32 = vsub.f32 %v4575_v62, %v4867_v37 }
 0x336   : > { %1954 = vperm.xlu1 %3511, %v4911_v36   ;;  %v4955_v27 = vpop.eup %3614  ;;  %3634 = vpow2.f32 %v1813_v56  ;;  %v1821_v56 = vmul.f32 1.442695, %v1721_v58  ;;  %v1791_v3 = vmul.f32 1.442695, %v1706_v28 }
 0x337   : > { %v4957_v4 = vpop.eup %3616  ;;  %3636 = vpow2.f32 %v1783_v1  ;;  %v1723_v1 = vsub.f32 %v5868_v49, %v4948_v50  ;;  %v1795_v49 = vmul.f32 1.442695, %v1708_v32 }
 0x338   : > { %v4965_v30 = vpop.eup %3618  ;;  %3638 = vpow2.f32 %v1817_v5  ;;  %v5871_v5 = vld [vmem:[#allocation34_spill] sm:$0xff] }
 0x339   : > { %1990 = vperm.xlu0 %3512, %v4919_v33   ;;  %v4967_v18 = vpop.eup %3620  ;;  %3640 = vpow2.f32 %v1787_v34  ;;  %v5872_v34 = vld [vmem:[#allocation43_spill] sm:$0xff] }
 0x33a   : > { %1957 = vperm.xlu1 %3511, %v4921_v48   ;;  %5862 = vst [vmem:[#allocation17_spill] sm:$0xff] %v4967_v18  ;;  %v4975_v9 = vpop.eup %3622  ;;  %3642 = vpow2.f32 %v1821_v56  ;;  %v1710_v28 = vsub.f32 %v5872_v34, %v4902_v17  ;;  %v5875_v56 = vld [vmem:[#allocation30_spill] sm:$0xff] }
 0x33b   : > { %v4977_v22 = vpop.eup %3624  ;;  %3644 = vpow2.f32 %v1791_v3  ;;  %v1712_v3 = vsub.f32 %v4632_v29, %v4902_v17  ;;  %v1714_v29 = vsub.f32 %v4774_v61, %v4902_v17 }
 0x33c   : > { %5864 = vst [vmem:[#allocation15_spill] sm:$0xff] %v4977_v22  ;;  %v4986_v16 = vpop.eup %3626 }
 0x33d   : > { %1996 = vperm.xlu0 %3512, %v4929_v41   ;;  %5866 = vst [vmem:[#allocation16_spill] sm:$0xff] %v4986_v16  ;;  %v4988_v51 = vpop.eup %3628  ;;  %v1807_v61 = vmul.f32 1.442695, %v1714_v29 }
 0x33e   : > { %1960 = vperm.xlu1 %3511, %v4931_v11   ;;  %5867 = vst [vmem:[#allocation26_spill] sm:$0xff] %v4988_v51  ;;  %v5001_v55 = vpop.eup %3630 }
 0x33f   : > { %5869 = vst [vmem:[#allocation37_spill] sm:$0xff] %v5001_v55  ;;  %v5003_v52 = vpop.eup %3632 }
 0x340   : > { %5870 = vst [vmem:[#allocation25_spill] sm:$0xff] %v5003_v52 }
 0x341   : > { %2002 = vperm.xlu0 %3512, %v4940_v63  }
 0x342   : > { %1963 = vperm.xlu1 %3511, %v4942_v43  }
 0x345   : > { %2008 = vperm.xlu0 %3512, %v4955_v27  }
 0x346   : > { %1966 = vperm.xlu1 %3511, %v4957_v4  }
 0x349   : > { %2014 = vperm.xlu0 %3512, %v4965_v30  }
 0x34a   : > { %1969 = vperm.xlu1 %3511, %v4967_v18  }
 0x34d   : > { %2020 = vperm.xlu0 %3512, %v4975_v9  }
 0x34e   : > { %1975 = vperm.xlu1 %3511, %v4977_v22   ;;  %v4994_v22 = vrot.slane %v4846_v2, %v5750_v0  ;;  %v1825_v0 = vmul.f32 1.442695, %v1723_v1 }
 0x350   : > { %v1725_v58 = vsub.f32 %v5871_v5, %v4994_v22  ;;  %3646 = vpow2.f32 %v1825_v0  ;;  %v1727_v1 = vsub.f32 %v5875_v56, %v4994_v22  ;;  %v1799_v5 = vmul.f32 1.442695, %v1710_v28 }
 0x351   : > { %2026 = vperm.xlu0 %3512, %v4986_v16   ;;  %3648 = vpow2.f32 %v1795_v49  ;;  %v1803_v49 = vmul.f32 1.442695, %v1712_v3 }
 0x352   : > { %1981 = vperm.xlu1 %3511, %v4988_v51   ;;  %v5011_v51 = vpop.eup %3634  ;;  %v1829_v37 = vmul.f32 1.442695, %v1725_v58  ;;  %v1833_v0 = vmul.f32 1.442695, %v1727_v1  ;;  %v5878_v58 = vld [vmem:[#allocation35_spill] sm:$0xff]  ;;  %v1731_v1 = vsub.f32 %v4548_v14, %v4994_v22 }
 0x353   : > { %5873 = vst [vmem:[#allocation23_spill] sm:$0xff] %v5011_v51  ;;  %v5013_v62 = vpop.eup %3636  ;;  %v1729_v56 = vsub.f32 %v5878_v58, %v4994_v22 }
 0x354   : > { %5874 = vst [vmem:[#allocation22_spill] sm:$0xff] %v5013_v62  ;;  %v5021_v32 = vpop.eup %3638  ;;  %3650 = vpow2.f32 %v1829_v37 }
 0x355   : > { %2032 = vperm.xlu0 %3512, %v5001_v55   ;;  %5876 = vst [vmem:[#allocation32_spill] sm:$0xff] %v5021_v32  ;;  %v5023_v34 = vpop.eup %3640  ;;  %3652 = vpow2.f32 %v1799_v5  ;;  %v1837_v37 = vmul.f32 1.442695, %v1729_v56  ;;  %v1716_v5 = vsub.f32 %v4746_v59, %v4902_v17 }
 0x356   : > { %1987 = vperm.xlu1 %3511, %v5003_v52   ;;  %5877 = vst [vmem:[#allocation31_spill] sm:$0xff] %v5023_v34  ;;  %v5755_v52 = vsub.s32 6, %v4179_v44  ;;  %v5032_v28 = vpop.eup %3642  ;;  %3654 = vpow2.f32 %v1833_v0  ;;  %v5883_v0 = vld [vmem:[#allocation39_spill] sm:$0xff] }
 0x357   : > { %5879 = vst [vmem:[#allocation19_spill] sm:$0xff] %v5032_v28  ;;  %3656 = vpow2.f32 %v1803_v49  ;;  %v1811_v14 = vmul.f32 1.442695, %v1716_v5  ;;  %v5884_v49 = vld [vmem:[#allocation20_spill] sm:$0xff] }
 0x358   : > { %3658 = vpow2.f32 %v1837_v37  ;;  %v1718_v29 = vsub.f32 %v5884_v49, %v4948_v50 }
 0x359   : > { %2038 = vperm.xlu0 %3512, %v5011_v51   ;;  %3660 = vpow2.f32 %v1807_v61  ;;  %v5887_v61 = vld [vmem:[#allocation18_spill] sm:$0xff] }
 0x35a   : > { %1993 = vperm.xlu1 %3511, %v5013_v62   ;;  %v5034_v62 = vpop.eup %3644  ;;  %v1720_v5 = vsub.f32 %v5887_v61, %v4948_v50 }
 0x35b   : > { %5880 = vst [vmem:[#allocation36_spill] sm:$0xff] %v5034_v62  ;;  %v5047_v3 = vpop.eup %3646 }
 0x35c   : > { %5881 = vst [vmem:[#allocation14_spill] sm:$0xff] %v5047_v3  ;;  %v5049_v58 = vpop.eup %3648 }
 0x35d   : > { %2044 = vperm.xlu0 %3512, %v5021_v32   ;;  %5882 = vst [vmem:[#allocation28_spill] sm:$0xff] %v5049_v58 }
 0x35e   : > { %1999 = vperm.xlu1 %3511, %v5023_v34   ;;  %v5040_v34 = vrot.slane %v4846_v2, %v5755_v52  ;;  %v1841_v52 = vmul.f32 1.442695, %v1731_v1  ;;  %v1815_v1 = vmul.f32 1.442695, %v1718_v29 }
 0x360   : > { %v1733_v56 = vsub.f32 %v5883_v0, %v5040_v34  ;;  %3662 = vpow2.f32 %v1841_v52  ;;  %v1735_v37 = vsub.f32 %v4564_v15, %v5040_v34  ;;  %v1737_v15 = vsub.f32 %v4611_v60, %v5040_v34 }
 0x361   : > { %2050 = vperm.xlu0 %3512, %v5032_v28   ;;  %3664 = vpow2.f32 %v1811_v14  ;;  %v5890_v14 = vld [vmem:[#allocation27_spill] sm:$0xff] }
 0x362   : > { %2005 = vperm.xlu1 %3511, %v5034_v62   ;;  %v5057_v62 = vpop.eup %3650  ;;  %v1845_v17 = vmul.f32 1.442695, %v1733_v56  ;;  %v1849_v52 = vmul.f32 1.442695, %v1735_v37  ;;  %v1819_v56 = vmul.f32 1.442695, %v1720_v5  ;;  %v1722_v29 = vsub.f32 %v5890_v14, %v4948_v50 }
 0x363   : > { %5885 = vst [vmem:[#allocation24_spill] sm:$0xff] %v5057_v62  ;;  %v5059_v59 = vpop.eup %3652  ;;  %v1853_v60 = vmul.f32 1.442695, %v1737_v15  ;;  %v5895_v15 = vld [vmem:[#allocation33_spill] sm:$0xff] }
 0x364   : > { %5886 = vst [vmem:[#allocation34_spill] sm:$0xff] %v5059_v59  ;;  %v5067_v0 = vpop.eup %3654  ;;  %3666 = vpow2.f32 %v1845_v17  ;;  %v1739_v17 = vsub.f32 %v4584_v46, %v5040_v34  ;;  %v1823_v37 = vmul.f32 1.442695, %v1722_v29 }
 0x365   : > { %2056 = vperm.xlu0 %3512, %v5047_v3   ;;  %5888 = vst [vmem:[#allocation43_spill] sm:$0xff] %v5067_v0  ;;  %v5069_v49 = vpop.eup %3656  ;;  %3668 = vpow2.f32 %v1815_v1  ;;  %v1724_v1 = vsub.f32 %v4514_v45, %v4948_v50 }
 0x366   : > { %2011 = vperm.xlu1 %3511, %v5049_v58   ;;  %5889 = vst [vmem:[#allocation30_spill] sm:$0xff] %v5069_v49  ;;  %v5760_v58 = vsub.s32 7, %v4179_v44  ;;  %v5078_v61 = vpop.eup %3658  ;;  %3670 = vpow2.f32 %v1849_v52 }
 0x367   : > { %5891 = vst [vmem:[#allocation35_spill] sm:$0xff] %v5078_v61  ;;  %3672 = vpow2.f32 %v1819_v56  ;;  %v1827_v46 = vmul.f32 1.442695, %v1724_v1  ;;  %v1726_v56 = vsub.f32 %v5895_v15, %v4994_v22 }
 0x368   : > { %3674 = vpow2.f32 %v1853_v60 }
 0x369   : > { %2062 = vperm.xlu0 %3512, %v5057_v62   ;;  %3676 = vpow2.f32 %v1823_v37 }
 0x36a   : > { %2017 = vperm.xlu1 %3511, %v5059_v59   ;;  %v5080_v59 = vpop.eup %3660 }
 0x36b   : > { %5892 = vst [vmem:[#allocation39_spill] sm:$0xff] %v5080_v59  ;;  %v5093_v5 = vpop.eup %3662 }
 0x36c   : > { %5893 = vst [vmem:[#allocation20_spill] sm:$0xff] %v5093_v5  ;;  %v5095_v14 = vpop.eup %3664 }
 0x36d   : > { %2068 = vperm.xlu0 %3512, %v5067_v0   ;;  %5894 = vst [vmem:[#allocation18_spill] sm:$0xff] %v5095_v14  ;;  %v5925_v0 = vld [vmem:[#allocation42_spill] sm:$0xff] }
 0x36e   : > { %2023 = vperm.xlu1 %3511, %v5069_v49   ;;  %v5086_v49 = vrot.slane %v4846_v2, %v5760_v58  ;;  %v1857_v2 = vmul.f32 1.442695, %v1739_v17  ;;  %v5103_v29 = vpop.eup %3666  ;;  %v5898_v17 = vld [vmem:[#allocation29_spill] sm:$0xff] }
 0x36f   : > { %5896 = vst [vmem:[#allocation27_spill] sm:$0xff] %v5103_v29  ;;  %v5105_v45 = vpop.eup %3668  ;;  %v1728_v37 = vsub.f32 %v5898_v17, %v4994_v22 }
 0x370   : > { %v1741_v52 = vsub.f32 %v4719_v13, %v5086_v49  ;;  %5897 = vst [vmem:[#allocation33_spill] sm:$0xff] %v5105_v45  ;;  %3678 = vpow2.f32 %v1857_v2  ;;  %v1743_v60 = vsub.f32 %v4664_v40, %v5086_v49  ;;  %v1831_v13 = vmul.f32 1.442695, %v1726_v56  ;;  %v5113_v1 = vpop.eup %3670 }
 0x371   : > { %2074 = vperm.xlu0 %3512, %v5078_v61   ;;  %3680 = vpow2.f32 %v1827_v46  ;;  %5899 = vst [vmem:[#allocation29_spill] sm:$0xff] %v5113_v1  ;;  %v5115_v15 = vpop.eup %3672  ;;  %v1745_v2 = vsub.f32 %v4803_v12, %v5086_v49  ;;  %v1835_v40 = vmul.f32 1.442695, %v1728_v37 }
 0x372   : > { %2029 = vperm.xlu1 %3511, %v5080_v59   ;;  %v1861_v50 = vmul.f32 1.442695, %v1741_v52  ;;  %5900 = vst [vmem:[#allocation45_spill] sm:$0xff] %v5115_v15  ;;  %v1865_v58 = vmul.f32 1.442695, %v1743_v60  ;;  %v1730_v52 = vsub.f32 %v4554_v35, %v4994_v22  ;;  %v5123_v46 = vpop.eup %3674  ;;  %v1732_v60 = vsub.f32 %v4546_v23, %v4994_v22  ;;  %v5923_v59 = vld [vmem:[#allocation41_spill] sm:$0xff] }
 0x373   : > { %5901 = vst [vmem:[#allocation46_spill] sm:$0xff] %v5123_v46  ;;  %v5125_v56 = vpop.eup %3676  ;;  %v1869_v17 = vmul.f32 1.442695, %v1745_v2  ;;  %v5905_v2 = vld [vmem:[#allocation38_spill] sm:$0xff]  ;;  %v1736_v22 = vsub.f32 %v4562_v47, %v5040_v34 }
 0x374   : > { %3682 = vpow2.f32 %v1861_v50  ;;  %5902 = vst [vmem:[#allocation47_spill] sm:$0xff] %v5125_v56  ;;  %v1747_v50 = vsub.f32 %v4826_v10, %v5086_v49  ;;  %v1839_v12 = vmul.f32 1.442695, %v1730_v52  ;;  %v1734_v10 = vsub.f32 %v5905_v2, %v5040_v34 }
 0x375   : > { %2080 = vperm.xlu0 %3512, %v5093_v5   ;;  %3684 = vpow2.f32 %v1831_v13 }
 0x376   : > { %2035 = vperm.xlu1 %3511, %v5095_v14   ;;  %3686 = vpow2.f32 %v1865_v58  ;;  %v1873_v37 = vmul.f32 1.442695, %v1747_v50  ;;  %v1843_v58 = vmul.f32 1.442695, %v1732_v60  ;;  %v1847_v23 = vmul.f32 1.442695, %v1734_v10 }
 0x377   : > { %3688 = vpow2.f32 %v1835_v40  ;;  %v1738_v60 = vsub.f32 %v4609_v54, %v5040_v34 }
 0x378   : > { %3690 = vpow2.f32 %v1869_v17 }
 0x379   : > { %2086 = vperm.xlu0 %3512, %v5103_v29   ;;  %3692 = vpow2.f32 %v1839_v12  ;;  %v1851_v12 = vmul.f32 1.442695, %v1736_v22  ;;  %v1855_v47 = vmul.f32 1.442695, %v1738_v60  ;;  %v5914_v22 = vld [vmem:[#allocation44_spill] sm:$0xff] }
 0x37a   : > { %2041 = vperm.xlu1 %3511, %v5105_v45   ;;  %v5133_v13 = vpop.eup %3678  ;;  %3694 = vpow2.f32 %v1873_v37 }
 0x37b   : > { %5903 = vst [vmem:[#allocation48_spill] sm:$0xff] %v5133_v13  ;;  %v5135_v35 = vpop.eup %3680  ;;  %3696 = vpow2.f32 %v1843_v58  ;;  %v1740_v58 = vsub.f32 %v4582_v21, %v5040_v34  ;;  %v1744_v21 = vsub.f32 %v4662_v24, %v5086_v49 }
 0x37c   : > { %5904 = vst [vmem:[#allocation49_spill] sm:$0xff] %v5135_v35  ;;  %3698 = vpow2.f32 %v1847_v23 }
 0x37d   : > { %2092 = vperm.xlu0 %3512, %v5113_v1   ;;  %3700 = vpow2.f32 %v1851_v12  ;;  %v1859_v54 = vmul.f32 1.442695, %v1740_v58  ;;  %v1867_v60 = vmul.f32 1.442695, %v1744_v21 }
 0x37e   : > { %2047 = vperm.xlu1 %3511, %v5115_v15   ;;  %v5141_v40 = vpop.eup %3682  ;;  %3702 = vpow2.f32 %v1855_v47  ;;  %v1746_v47 = vsub.f32 %v4801_v38, %v5086_v49 }
 0x37f   : > { %5906 = vst [vmem:[#allocation38_spill] sm:$0xff] %v5141_v40  ;;  %v5143_v52 = vpop.eup %3684  ;;  %3704 = vpow2.f32 %v1859_v54 }
 0x380   : > { %5907 = vst [vmem:[#allocation50_spill] sm:$0xff] %v5143_v52  ;;  %v5149_v17 = vpop.eup %3686 }
 0x381   : > { %2098 = vperm.xlu0 %3512, %v5123_v46   ;;  %5908 = vst [vmem:[#allocation51_spill] sm:$0xff] %v5149_v17  ;;  %v5151_v50 = vpop.eup %3688 }
 0x382   : > { %2053 = vperm.xlu1 %3511, %v5125_v56   ;;  %5909 = vst [vmem:[#allocation52_spill] sm:$0xff] %v5151_v50  ;;  %v5157_v2 = vpop.eup %3690 }
 0x383   : > { %5910 = vst [vmem:[#allocation53_spill] sm:$0xff] %v5157_v2  ;;  %v5159_v37 = vpop.eup %3692 }
 0x384   : > { %5911 = vst [vmem:[#allocation54_spill] sm:$0xff] %v5159_v37  ;;  %v5165_v10 = vpop.eup %3694 }
 0x385   : > { %2104 = vperm.xlu0 %3512, %v5133_v13   ;;  %5912 = vst [vmem:[#allocation55_spill] sm:$0xff] %v5165_v10  ;;  %v5167_v23 = vpop.eup %3696  ;;  %v1742_v13 = vsub.f32 %v5914_v22, %v5086_v49  ;;  %v1871_v22 = vmul.f32 1.442695, %v1746_v47 }
 0x386   : > { %2059 = vperm.xlu1 %3511, %v5135_v35   ;;  %5913 = vst [vmem:[#allocation56_spill] sm:$0xff] %v5167_v23  ;;  %v5173_v5 = vpop.eup %3698 }
 0x387   : > { %5915 = vst [vmem:[#allocation44_spill] sm:$0xff] %v5173_v5  ;;  %v1863_v12 = vmul.f32 1.442695, %v1742_v13  ;;  %v5178_v34 = vpop.eup %3700  ;;  %v1748_v13 = vsub.f32 %v4824_v26, %v5086_v49 }
 0x388   : > { %5916 = vst [vmem:[#allocation57_spill] sm:$0xff] %v5178_v34  ;;  %v5183_v58 = vpop.eup %3702 }
 0x389   : > { %2110 = vperm.xlu0 %3512, %v5141_v40   ;;  %3706 = vpow2.f32 %v1863_v12  ;;  %5917 = vst [vmem:[#allocation58_spill] sm:$0xff] %v5183_v58  ;;  %v5188_v54 = vpop.eup %3704  ;;  %v1875_v24 = vmul.f32 1.442695, %v1748_v13 }
 0x38a   : > { %2065 = vperm.xlu1 %3511, %v5143_v52   ;;  %3708 = vpow2.f32 %v1867_v60  ;;  %5918 = vst [vmem:[#allocation59_spill] sm:$0xff] %v5188_v54 }
 0x38b   : > { %3710 = vpow2.f32 %v1871_v22 }
 0x38c   : > { %3712 = vpow2.f32 %v1875_v24 }
 0x38d   : > { %2116 = vperm.xlu0 %3512, %v5149_v17  }
 0x38e   : > { %2071 = vperm.xlu1 %3511, %v5151_v50  }
 0x391   : > { %2122 = vperm.xlu0 %3512, %v5157_v2  }
 0x392   : > { %2077 = vperm.xlu1 %3511, %v5159_v37  }
 0x393   : > { %v5193_v21 = vpop.eup %3706 }
 0x394   : > { %5919 = vst [vmem:[#allocation60_spill] sm:$0xff] %v5193_v21  ;;  %v5200_v47 = vpop.eup %3708 }
 0x395   : > { %2128 = vperm.xlu0 %3512, %v5165_v10   ;;  %5920 = vst [vmem:[#allocation61_spill] sm:$0xff] %v5200_v47  ;;  %v5207_v22 = vpop.eup %3710 }
 0x396   : > { %2083 = vperm.xlu1 %3511, %v5167_v23   ;;  %5921 = vst [vmem:[#allocation62_spill] sm:$0xff] %v5207_v22  ;;  %v5214_v2 = vpop.eup %3712 }
 0x397   : > { %5922 = vst [vmem:[#allocation63_spill] sm:$0xff] %v5214_v2 }
 0x39a   : > { %2089 = vperm.xlu1 %3511, %v5173_v5  }
 0x39e   : > { %2095 = vperm.xlu1 %3511, %v5178_v34   ;;  %v5924_v34 = vld [vmem:[#allocation40_spill] sm:$0xff] }
 0x3a2   : > { %2101 = vperm.xlu1 %3511, %v5183_v58  }
 0x3a6   : > { %2107 = vperm.xlu1 %3511, %v5188_v54  }
 0x3a8   : > { %v5191_v12 = vpop.permute.xlu0 %1945 }
 0x3a9   : > { %v5195_v38 = vpop.permute.xlu1 %1942 }
 0x3aa   : > { %2113 = vperm.xlu1 %3511, %v5193_v21  }
 0x3ac   : > { %v5198_v60 = vpop.permute.xlu0 %1972 }
 0x3ad   : > { %v5202_v26 = vpop.permute.xlu1 %1948 }
 0x3ae   : > { %2119 = vperm.xlu1 %3511, %v5200_v47  }
 0x3b0   : > { %v5205_v49 = vpop.permute.xlu0 %1978 }
 0x3b1   : > { %v5209_v13 = vpop.permute.xlu1 %1951 }
 0x3b2   : > { %2125 = vperm.xlu1 %3511, %v5207_v22  }
 0x3b4   : > { %v5212_v10 = vpop.permute.xlu0 %1984 }
 0x3b5   : > { %v5216_v24 = vpop.permute.xlu1 %1954 }
 0x3b6   : > { %2131 = vperm.xlu1 %3511, %v5214_v2  }
 0x3b8   : > { %v1991_v46 = vpop.permute.xlu0 %1990 }
 0x3b9   : > { %v5219_v61 = vpop.permute.xlu1 %1957  ;;  %v2214_v47 = vrot.slane %v1991_v46, %v5923_v59 }
 0x3bc   : > { %v1997_v17 = vpop.permute.xlu0 %1996 }
 0x3bd   : > { %v5221_v1 = vpop.permute.xlu1 %1960  ;;  %v2223_v29 = vrot.slane %v1997_v17, %v5925_v0 }
 0x3c0   : > { %v2003_v40 = vpop.permute.xlu0 %2002 }
 0x3c1   : > { %v5223_v5 = vpop.permute.xlu1 %1963  ;;  %v2233_v55 = vrot.slane %v2003_v40, %v4607_v53 }
 0x3c4   : > { %v2009_v52 = vpop.permute.xlu0 %2008 }
 0x3c5   : > { %v1967_v35 = vpop.permute.xlu1 %1966 }
 0x3c8   : > { %v2015_v54 = vpop.permute.xlu0 %2014 }
 0x3c9   : > { %v1970_v56 = vpop.permute.xlu1 %1969 }
 0x3ca   : > { %v2179_v17 = vrot.slane %v1970_v56, %v5924_v34  ;;  %v2253_v56 = vrot.slane %v2015_v54, %v5923_v59  ;;  %v2194_v54 = vrot.slane %v5205_v49, %v4607_v53  ;;  %v2160_v49 = vrot.slane %v5219_v61, %v4618_v20 }
 0x3cc   : > { %v2021_v23 = vpop.permute.xlu0 %2020 }
 0x3cd   : > { %v1976_v15 = vpop.permute.xlu1 %1975 }
 0x3ce   : > { %v2189_v40 = vrot.slane %v1976_v15, %v4603_v39  ;;  %v2262_v15 = vrot.slane %v2021_v23, %v5925_v0 }
 0x3d0   : > { %v5225_v22 = vpop.permute.xlu0 %2026 }
 0x3d1   : > { %v1982_v45 = vpop.permute.xlu1 %1981 }
 0x3d4   : > { %v5227_v58 = vpop.permute.xlu0 %2032 }
 0x3d5   : > { %v5229_v2 = vpop.permute.xlu1 %1987 }
 0x3d8   : > { %v5231_v14 = vpop.permute.xlu0 %2038 }
 0x3d9   : > { %v1994_v37 = vpop.permute.xlu1 %1993 }
 0x3da   : > { %v2218_v50 = vrot.slane %v1994_v37, %v5924_v34  ;;  %v2243_v37 = vrot.slane %v2009_v52, %v4640_v25 }
 0x3dc   : > { %v2219_v21 = vsel %vm1308_vm0, %v2218_v50, %v2214_v47  ;;  %v5237_v3 = vpop.permute.xlu0 %2044 }
 0x3dd   : > { %v2000_v62 = vpop.permute.xlu1 %1999  ;;  %v2224_v32 = vsel %vm1315_vm1, %v2223_v29, %v2219_v21  ;;  %v2145_v21 = vrot.slane %v5202_v26, %v5925_v0  ;;  %v2150_v26 = vrot.slane %v5209_v13, %v4603_v39 }
 0x3de   : > { %v2228_v28 = vrot.slane %v2000_v62, %v4603_v39 }
 0x3e0   : > { %v2229_v51 = vsel %vm1322_vm2, %v2228_v28, %v2224_v32  ;;  %v5247_v47 = vpop.permute.xlu0 %2050  ;;  %v2175_v32 = vrot.slane %v1967_v35, %v5923_v59 }
 0x3e1   : > { %v2006_v18 = vpop.permute.xlu1 %2005  ;;  %v2234_v50 = vsel %vm1329_vm3, %v2233_v55, %v2229_v51  ;;  %v2140_v51 = vrot.slane %v5191_v12, %v5924_v34  ;;  %v2136_v55 = vrot.slane %v5195_v38, %v5923_v59  ;;  %v2199_v12 = vrot.slane %v1982_v45, %v4618_v20 }
 0x3e2   : > { %v2238_v46 = vrot.slane %v2006_v18, %v4618_v20  ;;  %v2180_v28 = vsel %vm1308_vm0, %v2179_v17, %v2175_v32  ;;  %v2184_v18 = vrot.slane %v5198_v60, %v5925_v0  ;;  %v2155_v45 = vrot.slane %v5216_v24, %v4607_v53 }
 0x3e3   : > { %v2141_v17 = vsel %vm1308_vm0, %v2140_v51, %v2136_v55  ;;  %v2204_v51 = vrot.slane %v5212_v10, %v4640_v25  ;;  %v2165_v55 = vrot.slane %v5221_v1, %v4640_v25  ;;  %v2272_v24 = vrot.slane %v5225_v22, %v4607_v53 }
 0x3e4   : > { %v2239_v16 = vsel %vm1336_vm4, %v2238_v46, %v2234_v50  ;;  %v2185_v60 = vsel %vm1315_vm1, %v2184_v18, %v2180_v28  ;;  %v2146_v32 = vsel %vm1315_vm1, %v2145_v21, %v2141_v17  ;;  %v2209_v18 = vrot.slane %v5229_v2, %v4637_v8 }
 0x3e5   : > { %v2244_v62 = vsel %vm1343_vm5, %v2243_v37, %v2239_v16  ;;  %v2012_v29 = vpop.permute.xlu1 %2011  ;;  %v5261_v16 = vpop.permute.xlu0 %2056  ;;  %v2190_v46 = vsel %vm1322_vm2, %v2189_v40, %v2185_v60  ;;  %v2170_v2 = vrot.slane %v5223_v5, %v4637_v8 }
 0x3e6   : > { %v2195_v28 = vsel %vm1329_vm3, %v2194_v54, %v2190_v46 }
 0x3e7   : > { %v2200_v40 = vsel %vm1336_vm4, %v2199_v12, %v2195_v28  ;;  %v2282_v12 = vrot.slane %v5227_v58, %v4640_v25 }
 0x3e8   : > { %v2205_v10 = vsel %vm1343_vm5, %v2204_v51, %v2200_v40 }
 0x3e9   : > { %v2018_v52 = vpop.permute.xlu1 %2017  ;;  %v2210_v22 = vsel %vm1350_vm6, %v2209_v18, %v2205_v10 }
 0x3ea   : > { %v2257_v35 = vrot.slane %v2018_v52, %v5924_v34  ;;  %v2063_v52 = vpop.permute.xlu0 %2062 }
 0x3ec   : > { %v2258_v37 = vsel %vm1308_vm0, %v2257_v35, %v2253_v56  ;;  %v2248_v56 = vrot.slane %v2012_v29, %v4637_v8  ;;  %v2151_v35 = vsel %vm1322_vm2, %v2150_v26, %v2146_v32 }
 0x3ed   : > { %v2263_v38 = vsel %vm1315_vm1, %v2262_v15, %v2258_v37  ;;  %v2024_v50 = vpop.permute.xlu1 %2023  ;;  %v2156_v15 = vsel %vm1329_vm3, %v2155_v45, %v2151_v35 }
 0x3ee   : > { %v2267_v23 = vrot.slane %v2024_v50, %v4603_v39  ;;  %v2161_v1 = vsel %vm1336_vm4, %v2160_v49, %v2156_v15  ;;  %v2249_v5 = vsel %vm1350_vm6, %v2248_v56, %v2244_v62 }
 0x3ef   : > { %v2166_v46 = vsel %vm1343_vm5, %v2165_v55, %v2161_v1 }
 0x3f0   : > { %v2268_v13 = vsel %vm1322_vm2, %v2267_v23, %v2263_v38  ;;  %v2171_v54 = vsel %vm1350_vm6, %v2170_v2, %v2166_v46  ;;  %v2069_v38 = vpop.permute.xlu0 %2068 }
 0x3f1   : > { %v2030_v61 = vpop.permute.xlu1 %2029  ;;  %v2273_v60 = vsel %vm1329_vm3, %v2272_v24, %v2268_v13  ;;  %v2445_v17 = vsel %vm1625_vm7, %v2210_v22, %v2171_v54 }
 0x3f2   : > { %v2277_v21 = vrot.slane %v2030_v61, %v4618_v20  ;;  %v2446_v23 = vsel %vm1627_vm8, %v2249_v5, %v2445_v17  ;;  %v2331_v5 = vrot.slane %v2063_v52, %v5923_v59 }
 0x3f4   : > { %v2278_v29 = vsel %vm1336_vm4, %v2277_v21, %v2273_v60  ;;  %v2075_v28 = vpop.permute.xlu0 %2074 }
 0x3f5   : > { %v2036_v37 = vpop.permute.xlu1 %2035  ;;  %v2283_v26 = vsel %vm1343_vm5, %v2282_v12, %v2278_v29  ;;  %v2292_v29 = vrot.slane %v5231_v14, %v5923_v59  ;;  %v2340_v14 = vrot.slane %v2069_v38, %v5925_v0 }
 0x3f6   : > { %v2287_v50 = vrot.slane %v2036_v37, %v4637_v8 }
 0x3f8   : > { %v2288_v32 = vsel %vm1350_vm6, %v2287_v50, %v2283_v26  ;;  %v5318_v40 = vpop.permute.xlu0 %2080  ;;  %v2301_v26 = vrot.slane %v5237_v3, %v5925_v0  ;;  %v2311_v3 = vrot.slane %v5247_v47, %v4607_v53 }
 0x3f9   : > { %v5316_v45 = vsel %vm1629_vm9, %v2288_v32, %v2446_v23  ;;  %v2042_v58 = vpop.permute.xlu1 %2041 }
 0x3fa   : > { %v2296_v1 = vrot.slane %v2042_v58, %v5924_v34 }
 0x3fc   : > { %v2087_v13 = vpop.permute.xlu0 %2086  ;;  %v2297_v50 = vsel %vm1308_vm0, %v2296_v1, %v2292_v29 }
 0x3fd   : > { %v2048_v62 = vpop.permute.xlu1 %2047  ;;  %v2370_v54 = vrot.slane %v2087_v13, %v5923_v59 }
 0x3fe   : > { %v2306_v17 = vrot.slane %v2048_v62, %v4603_v39 }
 0x400   : > { %v2093_v24 = vpop.permute.xlu0 %2092 }
 0x401   : > { %v2054_v49 = vpop.permute.xlu1 %2053  ;;  %v2379_v13 = vrot.slane %v2093_v24, %v5925_v0 }
 0x402   : > { %v2316_v38 = vrot.slane %v2054_v49, %v4618_v20 }
 0x404   : > { %v2099_v61 = vpop.permute.xlu0 %2098 }
 0x405   : > { %v5320_v18 = vpop.permute.xlu1 %2059 }
 0x408   : > { %v5324_v21 = vpop.permute.xlu0 %2104 }
 0x409   : > { %v2066_v51 = vpop.permute.xlu1 %2065 }
 0x40a   : > { %v2335_v22 = vrot.slane %v2066_v51, %v5924_v34 }
 0x40c   : > { %v2111_v10 = vpop.permute.xlu0 %2110  ;;  %v2336_v23 = vsel %vm1308_vm0, %v2335_v22, %v2331_v5 }
 0x40d   : > { %v2072_v55 = vpop.permute.xlu1 %2071  ;;  %v2409_v62 = vrot.slane %v2111_v10, %v5923_v59  ;;  %v2341_v22 = vsel %vm1315_vm1, %v2340_v14, %v2336_v23 }
 0x40e   : > { %v2345_v32 = vrot.slane %v2072_v55, %v4603_v39 }
 0x410   : > { %v2117_v37 = vpop.permute.xlu0 %2116 }
 0x411   : > { %v2078_v56 = vpop.permute.xlu1 %2077  ;;  %v2418_v10 = vrot.slane %v2117_v37, %v5925_v0 }
 0x412   : > { %v2355_v24 = vrot.slane %v2078_v56, %v4618_v20 }
 0x414   : > { %v2123_v29 = vpop.permute.xlu0 %2122 }
 0x415   : > { %v5322_v35 = vpop.permute.xlu1 %2083 }
 0x419   : > { %v2090_v2 = vpop.permute.xlu1 %2089 }
 0x41a   : > { %v2374_v46 = vrot.slane %v2090_v2, %v5924_v34  ;;  %v2302_v2 = vsel %vm1315_vm1, %v2301_v26, %v2297_v50  ;;  %v2389_v50 = vrot.slane %v2099_v61, %v4607_v53 }
 0x41b   : > { %v2307_v55 = vsel %vm1322_vm2, %v2306_v17, %v2302_v2 }
 0x41c   : > { %v2375_v58 = vsel %vm1308_vm0, %v2374_v46, %v2370_v54  ;;  %v2321_v54 = vrot.slane %v5261_v16, %v4640_v25  ;;  %v2312_v56 = vsel %vm1329_vm3, %v2311_v3, %v2307_v55  ;;  %v2365_v16 = vrot.slane %v5322_v35, %v4637_v8  ;;  %v2129_v35 = vpop.permute.xlu0 %2128 }
 0x41d   : > { %v2096_v15 = vpop.permute.xlu1 %2095  ;;  %v2380_v46 = vsel %vm1315_vm1, %v2379_v13, %v2375_v58  ;;  %v2317_v26 = vsel %vm1336_vm4, %v2316_v38, %v2312_v56  ;;  %v2438_v3 = vrot.slane %v2129_v35, %v4640_v25 }
 0x41e   : > { %v2384_v52 = vrot.slane %v2096_v15, %v4603_v39  ;;  %v2346_v15 = vsel %vm1322_vm2, %v2345_v32, %v2341_v22  ;;  %v2428_v32 = vrot.slane %v2123_v29, %v4607_v53 }
 0x420   : > { %v2385_v47 = vsel %vm1322_vm2, %v2384_v52, %v2380_v46  ;;  %v2399_v52 = vrot.slane %v5324_v21, %v4640_v25 }
 0x421   : > { %v2102_v60 = vpop.permute.xlu1 %2101  ;;  %v2390_v61 = vsel %vm1329_vm3, %v2389_v50, %v2385_v47  ;;  %v5927_v50 = vsub.s32 2, %v4179_v44 }
 0x422   : > { %v2394_v5 = vrot.slane %v2102_v60, %v4618_v20 }
 0x425   : > { %v2108_v12 = vpop.permute.xlu1 %2107 }
 0x426   : > { %v2404_v14 = vrot.slane %v2108_v12, %v4637_v8 }
 0x429   : > { %v2114_v51 = vpop.permute.xlu1 %2113 }
 0x42a   : > { %v2413_v1 = vrot.slane %v2114_v51, %v5924_v34  ;;  %v2350_v34 = vrot.slane %v2075_v28, %v4607_v53  ;;  %v2326_v28 = vrot.slane %v5320_v18, %v4637_v8  ;;  %v2395_v18 = vsel %vm1336_vm4, %v2394_v5, %v2390_v61 }
 0x42b   : > { %v2322_v51 = vsel %vm1343_vm5, %v2321_v54, %v2317_v26  ;;  %v5928_v26 = vsub.s32 3, %v4179_v44  ;;  %v5933_v61 = vsub.s32 4, %v4179_v44 }
 0x42c   : > { %v2414_v59 = vsel %vm1308_vm0, %v2413_v1, %v2409_v62  ;;  %v2351_v0 = vsel %vm1329_vm3, %v2350_v34, %v2346_v15  ;;  %v2327_v2 = vsel %vm1350_vm6, %v2326_v28, %v2322_v51  ;;  %v2400_v1 = vsel %vm1343_vm5, %v2399_v52, %v2395_v18  ;;  %v5936_v18 = vld [vmem:[#allocation32_spill] sm:$0xff]  ;;  %v5938_v51 = vld [vmem:[#allocation19_spill] sm:$0xff] }
 0x42d   : > { %v2120_v49 = vpop.permute.xlu1 %2119  ;;  %v2419_v37 = vsel %vm1315_vm1, %v2418_v10, %v2414_v59  ;;  %v2356_v60 = vsel %vm1336_vm4, %v2355_v24, %v2351_v0  ;;  %v2405_v21 = vsel %vm1350_vm6, %v2404_v14, %v2400_v1  ;;  %v5930_v0 = vld [vmem:[#allocation17_spill] sm:$0xff] }
 0x42e   : > { %v2423_v17 = vrot.slane %v2120_v49, %v4603_v39  ;;  %v2360_v39 = vrot.slane %v5318_v40, %v4640_v25 }
 0x430   : > { %v2424_v23 = vsel %vm1322_vm2, %v2423_v17, %v2419_v37  ;;  %v2361_v62 = vsel %vm1343_vm5, %v2360_v39, %v2356_v60  ;;  %v5935_v39 = vld [vmem:[#allocation15_spill] sm:$0xff] }
 0x431   : > { %v2126_v58 = vpop.permute.xlu1 %2125  ;;  %v2429_v40 = vsel %vm1329_vm3, %v2428_v32, %v2424_v23  ;;  %v2366_v53 = vsel %vm1350_vm6, %v2365_v16, %v2361_v62  ;;  %v5940_v62 = vld [vmem:[#allocation14_spill] sm:$0xff] }
 0x432   : > { %v2433_v13 = vrot.slane %v2126_v58, %v4618_v20  ;;  %v2448_v20 = vsel %vm1631_vm10, %v2327_v2, %v5316_v45  ;;  %v5926_v45 = vsub.s32 1, %v4179_v44  ;;  %v5937_v58 = vld [vmem:[#allocation21_spill] sm:$0xff] }
 0x433   : > { %v2449_v15 = vsel %vm1633_vm11, %v2366_v53, %v2448_v20  ;;  %v5941_v53 = vld [vmem:[#allocation25_spill] sm:$0xff]  ;;  %v5944_v20 = vld [vmem:[#allocation22_spill] sm:$0xff] }
 0x434   : > { %v2434_v12 = vsel %vm1336_vm4, %v2433_v13, %v2429_v40  ;;  %v2450_v24 = vsel %vm1635_vm12, %v2405_v21, %v2449_v15  ;;  %v5939_v13 = vld [vmem:[#allocation26_spill] sm:$0xff]  ;;  %v5943_v21 = vld [vmem:[#allocation24_spill] sm:$0xff] }
 0x435   : > { %v2132_v55 = vpop.permute.xlu1 %2131  ;;  %v2439_v22 = vsel %vm1343_vm5, %v2438_v3, %v2434_v12  ;;  %v5942_v12 = vsub.s32 5, %v4179_v44 }
 0x436   : > { %v2443_v38 = vrot.slane %v2132_v55, %v4637_v8 }
 0x438   : > { %v2444_v29 = vsel %vm1350_vm6, %v2443_v38, %v2439_v22  ;;  %v5945_v22 = vsub.s32 6, %v4179_v44 }
 0x439   : > { %v2451_v46 = vsel %vm1637_vm13, %v2444_v29, %v2450_v24  ;;  %v5946_v29 = vld [vmem:[#allocation27_spill] sm:$0xff] }
 0x43a   : > { %v2453_v25 = vsel %vm1640_vm14, %v2451_v46, 0.0  ;;  %v5947_v46 = vld [vmem:[#allocation31_spill] sm:$0xff] }
 0x43b   : > { %2454 = vadd.xlane.f32.xlu0 %v2453_v25 }
 0x4c8   : > { %v2455_v59 = vpop.xlane.xlu0 %2454 }
 0x4c9   : > { %3714 = vrcp.f32 %v2455_v59  ;;  %v5948_v59 = vld [vmem:[#allocation43_spill] sm:$0xff] }
 0x4d3   : > { %v5400_v34 = vpop.eup %3714 }
 0x4d4   : > { %v2465_v8 = vrot.slane %v5400_v34, %v5926_v45  ;;  %v2461_v10 = vrot.slane %v5400_v34, %v5846_v6  ;;  %v5414_v56 = vrot.slane %v5400_v34, %v5927_v50  ;;  %v5465_v3 = vrot.slane %v5400_v34, %v5942_v12  ;;  %v5952_v50 = vld [vmem:[#allocation28_spill] sm:$0xff]  ;;  %v5974_v12 = vld [vmem:[#allocation35_spill] sm:$0xff] }
 0x4d5   : > { %v5474_v15 = vrot.slane %v5400_v34, %v5945_v22 }
 0x4d6   : > { %v2506_v47 = vmul.f32 %v4957_v4, %v2465_v8  ;;  %v2498_v5 = vmul.f32 %v4877_v42, %v2461_v10  ;;  %v2512_v49 = vmul.f32 %v4909_v31, %v2465_v8  ;;  %v2499_v54 = vmul.f32 %v4875_v57, %v2461_v10 }
 0x4d7   : > { %v2514_v6 = vmul.f32 %v4919_v33, %v5414_v56  ;;  %v2500_v4 = vmul.f32 %v4886_v7, %v2461_v10  ;;  %v2516_v42 = vmul.f32 %v4929_v41, %v5414_v56  ;;  %v2501_v31 = vmul.f32 %v4896_v19, %v2461_v10 }
 0x4d8   : > { %2668 = vperm.xlu0 %3512, %v2506_v47   ;;  %2628 = vperm.xlu1 %3511, %v2498_v5   ;;  %v2518_v57 = vmul.f32 %v4940_v63, %v5414_v56  ;;  %v2502_v17 = vmul.f32 %v4911_v36, %v2461_v10  ;;  %v2520_v33 = vmul.f32 %v4955_v27, %v5414_v56  ;;  %v5950_v47 = vsub.s32 7, %v4179_v44  ;;  %v5955_v44 = vld [vmem:[#allocation57_spill] sm:$0xff] }
 0x4d9   : > { %v2503_v7 = vmul.f32 %v4921_v48, %v2461_v10  ;;  %v5431_v41 = vrot.slane %v5400_v34, %v5928_v26  ;;  %v2504_v63 = vmul.f32 %v4931_v11, %v2461_v10  ;;  %v2505_v27 = vmul.f32 %v4942_v43, %v2461_v10  ;;  %v5929_v48 = vld [vmem:[#allocation16_spill] sm:$0xff]  ;;  %v5932_v11 = vld [vmem:[#allocation13_spill] sm:$0xff]  ;;  %v5934_v43 = vld [vmem:[#allocation23_spill] sm:$0xff] }
 0x4da   : > { %v2507_v37 = vmul.f32 %v5930_v0, %v2465_v8  ;;  %v2508_v16 = vmul.f32 %v5932_v11, %v2465_v8  ;;  %v2509_v32 = vmul.f32 %v5935_v39, %v2465_v8  ;;  %v2510_v52 = vmul.f32 %v5937_v58, %v2465_v8  ;;  %v5958_v26 = vld [vmem:[#allocation39_spill] sm:$0xff] }
 0x4db   : > { %v2522_v19 = vmul.f32 %v4965_v30, %v5431_v41  ;;  %v2524_v36 = vmul.f32 %v4975_v9, %v5431_v41  ;;  %v2526_v28 = vmul.f32 %v5929_v48, %v5431_v41  ;;  %v5931_v30 = vld [vmem:[#allocation37_spill] sm:$0xff]  ;;  %v5448_v9 = vrot.slane %v5400_v34, %v5933_v61 }
 0x4dc   : > { %2698 = vperm.xlu0 %3512, %v2512_v49   ;;  %2633 = vperm.xlu1 %3511, %v2499_v54   ;;  %v2528_v60 = vmul.f32 %v5931_v30, %v5431_v41  ;;  %v2511_v2 = vmul.f32 %v5939_v13, %v2465_v8  ;;  %v2513_v1 = vmul.f32 %v5941_v53, %v2465_v8  ;;  %v5949_v8 = vld [vmem:[#allocation36_spill] sm:$0xff] }
 0x4dd   : > { %v2530_v23 = vmul.f32 %v5934_v43, %v5448_v9  ;;  %v2532_v14 = vmul.f32 %v5936_v18, %v5448_v9  ;;  %v2534_v35 = vmul.f32 %v5938_v51, %v5448_v9  ;;  %v2536_v40 = vmul.f32 %v5940_v62, %v5448_v9  ;;  %v5951_v49 = vld [vmem:[#allocation60_spill] sm:$0xff] }
 0x4de   : > { %v2538_v55 = vmul.f32 %v5943_v21, %v5465_v3  ;;  %v2515_v38 = vmul.f32 %v5944_v20, %v5414_v56  ;;  %v2546_v24 = vmul.f32 %v5946_v29, %v5474_v15  ;;  %v2517_v25 = vmul.f32 %v5947_v46, %v5414_v56 }
 0x4df   : > { %v2540_v45 = vmul.f32 %v5948_v59, %v5465_v3  ;;  %v2519_v10 = vmul.f32 %v5949_v8, %v5414_v56  ;;  %v5487_v5 = vrot.slane %v5400_v34, %v5950_v47  ;;  %v2549_v34 = vmul.f32 %v5955_v44, %v5474_v15  ;;  %v5976_v59 = vld [vmem:[#allocation53_spill] sm:$0xff] }
 0x4e0   : > { %2708 = vperm.xlu0 %3512, %v2514_v6   ;;  %2638 = vperm.xlu1 %3511, %v2500_v4   ;;  %v2521_v6 = vmul.f32 %v5952_v50, %v5414_v56  ;;  %v5953_v4 = vld [vmem:[#allocation52_spill] sm:$0xff]  ;;  %v5957_v56 = vld [vmem:[#allocation61_spill] sm:$0xff]  ;;  %v2542_v21 = vmul.f32 %v5974_v12, %v5465_v3 }
 0x4e1   : > { %v2555_v54 = vmul.f32 %v5951_v49, %v5487_v5  ;;  %v3717_v49 = vld [vmem:[%s4126_s5 + $0x8] sm:$0xff]  }
 0x4e2   : > { %v2565_v44 = vunpack.c.h.bf16 %v3717_v49 }
 0x4e4   : > { %2718 = vperm.xlu0 %3512, %v2516_v42   ;;  %2643 = vperm.xlu1 %3511, %v2501_v31   ;;  %v2541_v42 = vmul.f32 %v5953_v4, %v5465_v3  ;;  %v5954_v31 = vld [vmem:[#allocation34_spill] sm:$0xff] }
 0x4e8   : > { %2728 = vperm.xlu0 %3512, %v2518_v57   ;;  %2648 = vperm.xlu1 %3511, %v2502_v17   ;;  %v2523_v57 = vmul.f32 %v5954_v31, %v5431_v41  ;;  %v5956_v17 = vld [vmem:[#allocation30_spill] sm:$0xff] }
 0x4ec   : > { %2738 = vperm.xlu0 %3512, %v2520_v33   ;;  %2653 = vperm.xlu1 %3511, %v2503_v7   ;;  %v2525_v33 = vmul.f32 %v5956_v17, %v5431_v41  ;;  %v2557_v7 = vmul.f32 %v5957_v56, %v5487_v5  ;;  %v5978_v17 = vld [vmem:[#allocation48_spill] sm:$0xff] }
 0x4f0   : > { %2748 = vperm.xlu0 %3512, %v2522_v19   ;;  %2658 = vperm.xlu1 %3511, %v2504_v63   ;;  %v2527_v19 = vmul.f32 %v5958_v26, %v5431_v41  ;;  %v5959_v63 = vld [vmem:[#allocation54_spill] sm:$0xff] }
 0x4f4   : > { %2758 = vperm.xlu0 %3512, %v2524_v36   ;;  %2663 = vperm.xlu1 %3511, %v2505_v27   ;;  %v2543_v36 = vmul.f32 %v5959_v63, %v5465_v3  ;;  %v5960_v27 = vld [vmem:[#allocation18_spill] sm:$0xff] }
 0x4f5   : > { %v2529_v48 = vmul.f32 %v5960_v27, %v5431_v41  ;;  %v5965_v41 = vld [vmem:[#allocation56_spill] sm:$0xff] }
 0x4f6   : > { %v2545_v43 = vmul.f32 %v5965_v41, %v5465_v3  ;;  %v3719_v41 = vld [vmem:[%s4126_s5 + $0x18] sm:$0xff]  }
 0x4f8   : > { %2768 = vperm.xlu0 %3512, %v2526_v28   ;;  %2673 = vperm.xlu1 %3511, %v2507_v37   ;;  %v5961_v28 = vld [vmem:[#allocation58_spill] sm:$0xff]  ;;  %v5962_v37 = vld [vmem:[#allocation33_spill] sm:$0xff] }
 0x4f9   : > { %v2551_v0 = vmul.f32 %v5961_v28, %v5474_v15  ;;  %v2531_v30 = vmul.f32 %v5962_v37, %v5448_v9 }
 0x4fc   : > { %2778 = vperm.xlu0 %3512, %v2528_v60   ;;  %2678 = vperm.xlu1 %3511, %v2508_v16   ;;  %v5963_v60 = vld [vmem:[#allocation62_spill] sm:$0xff]  ;;  %v5964_v16 = vld [vmem:[#allocation45_spill] sm:$0xff] }
 0x4fd   : > { %v2559_v11 = vmul.f32 %v5963_v60, %v5487_v5  ;;  %v2533_v61 = vmul.f32 %v5964_v16, %v5448_v9 }
 0x500   : > { %2788 = vperm.xlu0 %3512, %v2530_v23   ;;  %2683 = vperm.xlu1 %3511, %v2509_v32   ;;  %v5966_v23 = vld [vmem:[#allocation47_spill] sm:$0xff] }
 0x501   : > { %v2535_v39 = vmul.f32 %v5966_v23, %v5448_v9  ;;  %v5967_v32 = vld [vmem:[#allocation59_spill] sm:$0xff] }
 0x502   : > { %v2553_v18 = vmul.f32 %v5967_v32, %v5474_v15 }
 0x504   : > { %2798 = vperm.xlu0 %3512, %v2532_v14   ;;  %2688 = vperm.xlu1 %3511, %v2510_v52   ;;  %v5968_v14 = vld [vmem:[#allocation49_spill] sm:$0xff]  ;;  %v5969_v52 = vld [vmem:[#allocation50_spill] sm:$0xff] }
 0x505   : > { %v2537_v58 = vmul.f32 %v5968_v14, %v5448_v9  ;;  %v2539_v51 = vmul.f32 %v5969_v52, %v5465_v3  ;;  %v5973_v9 = vld [vmem:[#allocation51_spill] sm:$0xff] }
 0x508   : > { %2808 = vperm.xlu0 %3512, %v2534_v35   ;;  %2693 = vperm.xlu1 %3511, %v2511_v2   ;;  %v5970_v35 = vld [vmem:[#allocation44_spill] sm:$0xff]  ;;  %v5971_v2 = vld [vmem:[#allocation38_spill] sm:$0xff] }
 0x509   : > { %v2547_v13 = vmul.f32 %v5970_v35, %v5474_v15  ;;  %v2554_v62 = vmul.f32 %v5971_v2, %v5487_v5 }
 0x50c   : > { %2818 = vperm.xlu0 %3512, %v2536_v40   ;;  %2703 = vperm.xlu1 %3511, %v2513_v1   ;;  %v5972_v40 = vld [vmem:[#allocation29_spill] sm:$0xff]  ;;  %v2556_v1 = vmul.f32 %v5973_v9, %v5487_v5 }
 0x50d   : > { %v2548_v53 = vmul.f32 %v5972_v40, %v5474_v15 }
 0x510   : > { %2828 = vperm.xlu0 %3512, %v2538_v55   ;;  %2713 = vperm.xlu1 %3511, %v2515_v38   ;;  %v3716_v55 = vld [vmem:[%s4126_s5] sm:$0xff]   ;;  %v5975_v38 = vld [vmem:[#allocation46_spill] sm:$0xff] }
 0x511   : > { %v2562_v20 = vunpack.c.l.bf16 %v3716_v55  ;;  %v2550_v22 = vmul.f32 %v5975_v38, %v5474_v15  ;;  %v2563_v46 = vunpack.c.h.bf16 %v3716_v55 }
 0x514   : > { %2868 = vperm.xlu0 %3512, %v2546_v24   ;;  %2723 = vperm.xlu1 %3511, %v2517_v25  }
 0x518   : > { %2838 = vperm.xlu0 %3512, %v2540_v45   ;;  %2733 = vperm.xlu1 %3511, %v2519_v10   ;;  %v2558_v45 = vmul.f32 %v5976_v59, %v5487_v5  ;;  %v3722_v59 = vld [vmem:[%s4126_s5 + $0x30] sm:$0xff]  }
 0x51c   : > { %2913 = vperm.xlu0 %3512, %v2555_v54   ;;  %2743 = vperm.xlu1 %3511, %v2521_v6   ;;  %v2564_v54 = vunpack.c.l.bf16 %v3717_v49  ;;  %v5977_v6 = vld [vmem:[#allocation20_spill] sm:$0xff] }
 0x51d   : > { %v2544_v4 = vmul.f32 %v5977_v6, %v5465_v3  ;;  %v5979_v3 = vld [vmem:[#allocation55_spill] sm:$0xff] }
 0x51e   : > { %v2560_v27 = vmul.f32 %v5979_v3, %v5487_v5 }
 0x520   : > { %2843 = vperm.xlu0 %3512, %v2541_v42   ;;  %2753 = vperm.xlu1 %3511, %v2523_v57  }
 0x524   : > { %2883 = vperm.xlu0 %3512, %v2549_v34   ;;  %2763 = vperm.xlu1 %3511, %v2525_v33   ;;  %v2552_v33 = vmul.f32 %v5978_v17, %v5474_v15 }
 0x528   : > { %2923 = vperm.xlu0 %3512, %v2557_v7   ;;  %2773 = vperm.xlu1 %3511, %v2527_v19   ;;  %v3718_v19 = vld [vmem:[%s4126_s5 + $0x10] sm:$0xff]  }
 0x529   : > { %v2566_v63 = vunpack.c.l.bf16 %v3718_v19  ;;  %v2567_v37 = vunpack.c.h.bf16 %v3718_v19 }
 0x52c   : > { %2853 = vperm.xlu0 %3512, %v2543_v36   ;;  %2783 = vperm.xlu1 %3511, %v2529_v48  }
 0x530   : > { %2893 = vperm.xlu0 %3512, %v2551_v0   ;;  %2793 = vperm.xlu1 %3511, %v2531_v30   ;;  %v5980_v30 = vld [vmem:[#allocation63_spill] sm:$0xff] }
 0x531   : > { %v2561_v60 = vmul.f32 %v5980_v30, %v5487_v5 }
 0x534   : > { %2933 = vperm.xlu0 %3512, %v2559_v11   ;;  %2803 = vperm.xlu1 %3511, %v2533_v61  }
 0x538   : > { %2863 = vperm.xlu0 %3512, %v2545_v43   ;;  %2813 = vperm.xlu1 %3511, %v2535_v39   ;;  %v2568_v43 = vunpack.c.l.bf16 %v3719_v41 }
 0x53c   : > { %2903 = vperm.xlu0 %3512, %v2553_v18   ;;  %2823 = vperm.xlu1 %3511, %v2537_v58   ;;  %v2569_v18 = vunpack.c.h.bf16 %v3719_v41 }
 0x540   : > { %2833 = vperm.xlu1 %3511, %v2539_v51   ;;  %v3720_v51 = vld [vmem:[%s4126_s5 + $0x20] sm:$0xff]  }
 0x541   : > { %v2570_v35 = vunpack.c.l.bf16 %v3720_v51  ;;  %v2571_v5 = vunpack.c.h.bf16 %v3720_v51 }
 0x544   : > { %2873 = vperm.xlu1 %3511, %v2547_v13  }
 0x548   : > { %2908 = vperm.xlu1 %3511, %v2554_v62  }
 0x54c   : > { %2878 = vperm.xlu1 %3511, %v2548_v53  }
 0x550   : > { %2918 = vperm.xlu1 %3511, %v2556_v1   ;;  %v3721_v1 = vld [vmem:[%s4126_s5 + $0x28] sm:$0xff]  }
 0x551   : > { %v2572_v12 = vunpack.c.l.bf16 %v3721_v1  ;;  %v2573_v38 = vunpack.c.h.bf16 %v3721_v1 }
 0x554   : > { %2848 = vperm.xlu1 %3511, %v2542_v21  }
 0x557   : > { %v2669_v29 = vpop.permute.xlu0 %2668  ;;  %v2629_v24 = vpop.permute.xlu1 %2628 }
 0x558   : > { %v2946_v25 = vmul.f32 %v2629_v24, %v2562_v20  ;;  %2888 = vperm.xlu1 %3511, %v2550_v22   ;;  %v2954_v53 = vmul.f32 %v2669_v29, %v2570_v35 }
 0x55b   : > { %v5542_v8 = vpop.permute.xlu0 %2698  ;;  %v2634_v10 = vpop.permute.xlu1 %2633 }
 0x55c   : > { %v2947_v47 = vmul.f32 %v2634_v10, %v2563_v46  ;;  %2928 = vperm.xlu1 %3511, %v2558_v45   ;;  %v2574_v45 = vunpack.c.l.bf16 %v3722_v59 }
 0x55e   : > { %v3010_v50 = vadd.f32 %v2947_v47, %v2946_v25 }
 0x55f   : > { %v5547_v42 = vpop.permute.xlu0 %2708  ;;  %v2639_v31 = vpop.permute.xlu1 %2638 }
 0x560   : > { %v2948_v57 = vmul.f32 %v2639_v31, %v2564_v54  ;;  %2858 = vperm.xlu1 %3511, %v2544_v4   ;;  %v2575_v54 = vunpack.c.h.bf16 %v3722_v59 }
 0x562   : > { %v3011_v34 = vadd.f32 %v3010_v50, %v2948_v57  ;;  %v3723_v50 = vld [vmem:[%s4126_s5 + $0x38] sm:$0xff]  }
 0x563   : > { %v5551_v56 = vpop.permute.xlu0 %2718  ;;  %v2644_v7 = vpop.permute.xlu1 %2643  ;;  %v2576_v6 = vunpack.c.l.bf16 %v3723_v50 }
 0x564   : > { %v2949_v26 = vmul.f32 %v2644_v7, %v2565_v44  ;;  %2898 = vperm.xlu1 %3511, %v2552_v33  }
 0x565   : > { %v2960_v33 = vmul.f32 %v5542_v8, %v2576_v6 }
 0x566   : > { %v3012_v36 = vadd.f32 %v3011_v34, %v2949_v26  ;;  %v2577_v34 = vunpack.c.h.bf16 %v3723_v50 }
 0x567   : > { %v5556_v48 = vpop.permute.xlu0 %2728  ;;  %v2649_v28 = vpop.permute.xlu1 %2648 }
 0x568   : > { %v2950_v0 = vmul.f32 %v2649_v28, %v2566_v63  ;;  %2938 = vperm.xlu1 %3511, %v2560_v27   ;;  %v3724_v63 = vld [vmem:[%s4126_s5 + $0x40] sm:$0xff]  }
 0x569   : > { %v2579_v28 = vunpack.c.h.bf16 %v3724_v63 }
 0x56a   : > { %v3013_v15 = vadd.f32 %v3012_v36, %v2950_v0  ;;  %v2578_v36 = vunpack.c.l.bf16 %v3724_v63  ;;  %v3725_v0 = vld [vmem:[%s4126_s5 + $0x48] sm:$0xff]  }
 0x56b   : > { %v5560_v11 = vpop.permute.xlu0 %2738  ;;  %v2654_v16 = vpop.permute.xlu1 %2653 }
 0x56c   : > { %v2951_v61 = vmul.f32 %v2654_v16, %v2567_v37  ;;  %2943 = vperm.xlu1 %3511, %v2561_v60   ;;  %v2580_v37 = vunpack.c.l.bf16 %v3725_v0 }
 0x56e   : > { %v3014_v23 = vadd.f32 %v3013_v15, %v2951_v61  ;;  %v2962_v61 = vmul.f32 %v5547_v42, %v2578_v36  ;;  %v3730_v36 = vld [vmem:[%s4126_s5 + $0x70] sm:$0xff]  }
 0x56f   : > { %v2659_v39 = vpop.permute.xlu1 %2658  ;;  %v5563_v14 = vpop.permute.xlu0 %2748 }
 0x570   : > { %v2952_v32 = vmul.f32 %v2659_v39, %v2568_v43  ;;  %v2581_v43 = vunpack.c.h.bf16 %v3725_v0 }
 0x572   : > { %v3015_v58 = vadd.f32 %v3014_v23, %v2952_v32  ;;  %v3726_v23 = vld [vmem:[%s4126_s5 + $0x50] sm:$0xff]   ;;  %v2964_v32 = vmul.f32 %v5551_v56, %v2580_v37 }
 0x573   : > { %v2664_v52 = vpop.permute.xlu1 %2663  ;;  %v5566_v62 = vpop.permute.xlu0 %2758  ;;  %v2582_v39 = vunpack.c.l.bf16 %v3726_v23 }
 0x574   : > { %v2953_v13 = vmul.f32 %v2664_v52, %v2569_v18 }
 0x575   : > { %v2966_v42 = vmul.f32 %v5556_v48, %v2582_v39 }
 0x576   : > { %v3016_v2 = vadd.f32 %v3015_v58, %v2953_v13 }
 0x577   : > { %v2674_v40 = vpop.permute.xlu1 %2673  ;;  %v5569_v22 = vpop.permute.xlu0 %2768 }
 0x578   : > { %v2955_v9 = vmul.f32 %v2674_v40, %v2571_v5  ;;  %v3017_v4 = vrot.slane %v3016_v2, 4  ;;  %v3727_v40 = vld [vmem:[%s4126_s5 + $0x58] sm:$0xff]  }
 0x57a   : > { %v3023_v21 = vadd.f32 %v2955_v9, %v2954_v53  ;;  %v3018_v7 = vadd.f32 %v3017_v4, %v3016_v2  ;;  %v2583_v2 = vunpack.c.h.bf16 %v3726_v23  ;;  %v2584_v53 = vunpack.c.l.bf16 %v3727_v40 }
 0x57b   : > { %v2679_v55 = vpop.permute.xlu1 %2678  ;;  %v5572_v47 = vpop.permute.xlu0 %2778 }
 0x57c   : > { %v2956_v20 = vmul.f32 %v2679_v55, %v2572_v12  ;;  %v3019_v15 = vrot.slane %v3018_v7, 2 }
 0x57e   : > { %v3024_v24 = vadd.f32 %v3023_v21, %v2956_v20  ;;  %v3020_v18 = vadd.f32 %v3019_v15, %v3018_v7 }
 0x57f   : > { %v2684_v46 = vpop.permute.xlu1 %2683  ;;  %v5575_v17 = vpop.permute.xlu0 %2788 }
 0x580   : > { %v2957_v25 = vmul.f32 %v2684_v46, %v2573_v38  ;;  %v3021_v1 = vrot.slane %v3020_v18, 1  ;;  %v2968_v46 = vmul.f32 %v5560_v11, %v2584_v53 }
 0x582   : > { %v3025_v10 = vadd.f32 %v3024_v24, %v2957_v25  ;;  %v2585_v24 = vunpack.c.h.bf16 %v3727_v40  ;;  %v3022_v25 = vadd.f32 %v3021_v1, %v3020_v18 }
 0x583   : > { %v2689_v29 = vpop.permute.xlu1 %2688  ;;  %v5580_v60 = vpop.permute.xlu0 %2798 }
 0x584   : > { %v2958_v49 = vmul.f32 %v2689_v29, %v2574_v45 }
 0x586   : > { %v3026_v31 = vadd.f32 %v3025_v10, %v2958_v49  ;;  %v3728_v10 = vld [vmem:[%s4126_s5 + $0x60] sm:$0xff]  }
 0x587   : > { %v2694_v57 = vpop.permute.xlu1 %2693  ;;  %v5586_v9 = vpop.permute.xlu0 %2808  ;;  %v2586_v29 = vunpack.c.l.bf16 %v3728_v10  ;;  %v2587_v4 = vunpack.c.h.bf16 %v3728_v10 }
 0x588   : > { %v2959_v44 = vmul.f32 %v2694_v57, %v2575_v54 }
 0x589   : > { %v2970_v11 = vmul.f32 %v5563_v14, %v2586_v29 }
 0x58a   : > { %v3027_v26 = vadd.f32 %v3026_v31, %v2959_v44  ;;  %v3729_v31 = vld [vmem:[%s4126_s5 + $0x68] sm:$0xff]  }
 0x58b   : > { %v2704_v19 = vpop.permute.xlu1 %2703  ;;  %v5591_v49 = vpop.permute.xlu0 %2818  ;;  %v2588_v57 = vunpack.c.l.bf16 %v3729_v31 }
 0x58c   : > { %v3028_v3 = vadd.f32 %v3027_v26, %v2960_v33  ;;  %v2961_v27 = vmul.f32 %v2704_v19, %v2577_v34  ;;  %v2589_v26 = vunpack.c.h.bf16 %v3729_v31 }
 0x58d   : > { %v2972_v63 = vmul.f32 %v5566_v62, %v2588_v57 }
 0x58e   : > { %v3029_v30 = vadd.f32 %v3028_v3, %v2961_v27  ;;  %v2590_v3 = vunpack.c.l.bf16 %v3730_v36 }
 0x58f   : > { %v2714_v16 = vpop.permute.xlu1 %2713  ;;  %v5596_v19 = vpop.permute.xlu0 %2828 }
 0x590   : > { %v3030_v8 = vrot.slane %v3029_v30, 4  ;;  %v2963_v41 = vmul.f32 %v2714_v16, %v2579_v28  ;;  %v2591_v16 = vunpack.c.h.bf16 %v3730_v36  ;;  %v2974_v14 = vmul.f32 %v5569_v22, %v2590_v3 }
 0x592   : > { %v3031_v58 = vadd.f32 %v3030_v8, %v3029_v30  ;;  %v3036_v52 = vadd.f32 %v2963_v41, %v2962_v61  ;;  %v3731_v61 = vld [vmem:[%s4126_s5 + $0x78] sm:$0xff]  }
 0x593   : > { %v2724_v51 = vpop.permute.xlu1 %2723  ;;  %v2592_v8 = vunpack.c.l.bf16 %v3731_v61  ;;  %v5602_v23 = vpop.permute.xlu0 %2868 }
 0x594   : > { %v3032_v35 = vrot.slane %v3031_v58, 2  ;;  %v3037_v13 = vadd.f32 %v3036_v52, %v2964_v32  ;;  %v2965_v5 = vmul.f32 %v2724_v51, %v2581_v43 }
 0x595   : > { %v2976_v52 = vmul.f32 %v5572_v47, %v2592_v8 }
 0x596   : > { %v3033_v12 = vadd.f32 %v3032_v35, %v3031_v58  ;;  %v3038_v21 = vadd.f32 %v3037_v13, %v2965_v5  ;;  %v2593_v58 = vunpack.c.h.bf16 %v3731_v61  ;;  %v3732_v13 = vld [vmem:[%s4126_s5 + $0x80] sm:$0xff]  }
 0x597   : > { %v2734_v55 = vpop.permute.xlu1 %2733  ;;  %v2594_v5 = vunpack.c.l.bf16 %v3732_v13  ;;  %v5607_v1 = vpop.permute.xlu0 %2838 }
 0x598   : > { %v3034_v56 = vrot.slane %v3033_v12, 1  ;;  %v3039_v20 = vadd.f32 %v3038_v21, %v2966_v42  ;;  %v2967_v38 = vmul.f32 %v2734_v55, %v2583_v2  ;;  %v2595_v2 = vunpack.c.h.bf16 %v3732_v13 }
 0x599   : > { %v2978_v47 = vmul.f32 %v5575_v17, %v2594_v5 }
 0x59a   : > { %v3035_v59 = vadd.f32 %v3034_v56, %v3033_v12  ;;  %v3040_v45 = vadd.f32 %v3039_v20, %v2967_v38  ;;  %v3733_v12 = vld [vmem:[%s4126_s5 + $0x88] sm:$0xff]  }
 0x59b   : > { %v2744_v48 = vpop.permute.xlu1 %2743  ;;  %v2596_v21 = vunpack.c.l.bf16 %v3733_v12  ;;  %v2597_v38 = vunpack.c.h.bf16 %v3733_v12  ;;  %v3738_v12 = vld [vmem:[%s4126_s5 + $0xc0] sm:$0xff]  }
 0x59c   : > { %v3122_v54 = vsel %vm1625_vm7, %v3035_v59, %v3022_v25  ;;  %v3041_v50 = vadd.f32 %v3040_v45, %v2968_v46  ;;  %v2969_v6 = vmul.f32 %v2744_v48, %v2585_v24  ;;  %v3734_v46 = vld [vmem:[%s4126_s5 + $0x90] sm:$0xff]   ;;  %v5613_v45 = vpop.permute.xlu0 %2913 }
 0x59d   : > { %v2980_v24 = vmul.f32 %v5580_v60, %v2596_v21  ;;  %v2598_v25 = vunpack.c.l.bf16 %v3734_v46  ;;  %v2611_v21 = vunpack.c.h.bf16 %v3738_v12 }
 0x59e   : > { %v3042_v44 = vadd.f32 %v3041_v50, %v2969_v6  ;;  %v2599_v50 = vunpack.c.h.bf16 %v3734_v46 }
 0x59f   : > { %v2754_v34 = vpop.permute.xlu1 %2753  ;;  %v2982_v6 = vmul.f32 %v5586_v9, %v2598_v25 }
 0x5a0   : > { %v3043_v33 = vrot.slane %v3042_v44, 4  ;;  %v2971_v7 = vmul.f32 %v2754_v34, %v2587_v4  ;;  %v3735_v4 = vld [vmem:[%s4126_s5 + $0x98] sm:$0xff]  }
 0x5a1   : > { %v2600_v31 = vunpack.c.l.bf16 %v3735_v4  ;;  %v2601_v60 = vunpack.c.h.bf16 %v3735_v4 }
 0x5a2   : > { %v3044_v27 = vadd.f32 %v3043_v33, %v3042_v44  ;;  %v3049_v28 = vadd.f32 %v2971_v7, %v2970_v11  ;;  %v2844_v33 = vpop.permute.xlu0 %2843 }
 0x5a3   : > { %v2764_v0 = vpop.permute.xlu1 %2763  ;;  %v2984_v7 = vmul.f32 %v5591_v49, %v2600_v31 }
 0x5a4   : > { %v3045_v37 = vrot.slane %v3044_v27, 2  ;;  %v3050_v15 = vadd.f32 %v3049_v28, %v2972_v63  ;;  %v2973_v30 = vmul.f32 %v2764_v0, %v2589_v26 }
 0x5a6   : > { %v3046_v41 = vadd.f32 %v3045_v37, %v3044_v27  ;;  %v3051_v43 = vadd.f32 %v3050_v15, %v2973_v30  ;;  %v5618_v0 = vpop.permute.xlu0 %2883 }
 0x5a7   : > { %v2774_v39 = vpop.permute.xlu1 %2773 }
 0x5a8   : > { %v3047_v62 = vrot.slane %v3046_v41, 1  ;;  %v3052_v32 = vadd.f32 %v3051_v43, %v2974_v14  ;;  %v2975_v18 = vmul.f32 %v2774_v39, %v2591_v16 }
 0x5aa   : > { %v3048_v51 = vadd.f32 %v3047_v62, %v3046_v41  ;;  %v3053_v35 = vadd.f32 %v3052_v32, %v2975_v18  ;;  %v5620_v8 = vpop.permute.xlu0 %2923  ;;  %v3736_v32 = vld [vmem:[%s4126_s5 + $0xa0] sm:$0xff]  }
 0x5ab   : > { %v2784_v22 = vpop.permute.xlu1 %2783  ;;  %v2603_v18 = vunpack.c.h.bf16 %v3736_v32 }
 0x5ac   : > { %v3123_v40 = vsel %vm1627_vm8, %v3048_v51, %v3122_v54  ;;  %v3054_v53 = vadd.f32 %v3053_v35, %v2976_v52  ;;  %v2977_v42 = vmul.f32 %v2784_v22, %v2593_v58  ;;  %v2602_v35 = vunpack.c.l.bf16 %v3736_v32 }
 0x5ae   : > { %v3055_v55 = vadd.f32 %v3054_v53, %v2977_v42  ;;  %v2854_v58 = vpop.permute.xlu0 %2853  ;;  %v3737_v53 = vld [vmem:[%s4126_s5 + $0xa8] sm:$0xff]  }
 0x5af   : > { %v2794_v56 = vpop.permute.xlu1 %2793  ;;  %v2604_v42 = vunpack.c.l.bf16 %v3737_v53  ;;  %v2605_v46 = vunpack.c.h.bf16 %v3737_v53 }
 0x5b0   : > { %v2979_v20 = vmul.f32 %v2794_v56, %v2595_v2  ;;  %v3056_v10 = vrot.slane %v3055_v55, 4  ;;  %v2986_v2 = vmul.f32 %v5596_v19, %v2602_v35  ;;  %v2610_v56 = vunpack.c.l.bf16 %v3738_v12 }
 0x5b2   : > { %v3062_v59 = vadd.f32 %v2979_v20, %v2978_v47  ;;  %v3057_v17 = vadd.f32 %v3056_v10, %v3055_v55  ;;  %v2894_v55 = vpop.permute.xlu0 %2893  ;;  %v3739_v20 = vld [vmem:[%s4126_s5 + $0xc8] sm:$0xff]   ;;  %v2994_v19 = vmul.f32 %v5602_v23, %v2610_v56 }
 0x5b3   : > { %v2804_v29 = vpop.permute.xlu1 %2803  ;;  %v2613_v4 = vunpack.c.h.bf16 %v3739_v20 }
 0x5b4   : > { %v3063_v48 = vadd.f32 %v3062_v59, %v2980_v24  ;;  %v2981_v54 = vmul.f32 %v2804_v29, %v2597_v38  ;;  %v3058_v63 = vrot.slane %v3057_v17, 2  ;;  %v2988_v24 = vmul.f32 %v5607_v1, %v2604_v42  ;;  %v3740_v59 = vld [vmem:[%s4126_s5 + $0xb0] sm:$0xff]  }
 0x5b5   : > { %v2606_v10 = vunpack.c.l.bf16 %v3740_v59 }
 0x5b6   : > { %v3064_v57 = vadd.f32 %v3063_v48, %v2981_v54  ;;  %v3059_v9 = vadd.f32 %v3058_v63, %v3057_v17  ;;  %v3741_v48 = vld [vmem:[%s4126_s5 + $0xe0] sm:$0xff]   ;;  %v2934_v31 = vpop.permute.xlu0 %2933 }
 0x5b7   : > { %v2814_v44 = vpop.permute.xlu1 %2813  ;;  %v2618_v54 = vunpack.c.l.bf16 %v3741_v48 }
 0x5b8   : > { %v3065_v34 = vadd.f32 %v3064_v57, %v2982_v6  ;;  %v2983_v11 = vmul.f32 %v2814_v44, %v2599_v50  ;;  %v3060_v16 = vrot.slane %v3059_v9, 1  ;;  %v2619_v6 = vunpack.c.h.bf16 %v3741_v48  ;;  %v3742_v57 = vld [vmem:[%s4126_s5 + $0xe8] sm:$0xff]  }
 0x5b9   : > { %v2620_v17 = vunpack.c.l.bf16 %v3742_v57 }
 0x5ba   : > { %v3066_v26 = vadd.f32 %v3065_v34, %v2983_v11  ;;  %v3061_v41 = vadd.f32 %v3060_v16, %v3059_v9  ;;  %v2989_v34 = vmul.f32 %v2844_v33, %v2605_v46  ;;  %v2621_v16 = vunpack.c.h.bf16 %v3742_v57 }
 0x5bb   : > { %v2824_v36 = vpop.permute.xlu1 %2823 }
 0x5bc   : > { %v3067_v3 = vadd.f32 %v3066_v26, %v2984_v7  ;;  %v2985_v27 = vmul.f32 %v2824_v36, %v2601_v60  ;;  %v3124_v52 = vsel %vm1629_vm9, %v3061_v41, %v3123_v40  ;;  %v2612_v40 = vunpack.c.l.bf16 %v3739_v20  ;;  %v3743_v60 = vld [vmem:[%s4126_s5 + $0xd0] sm:$0xff]   ;;  %v3747_v20 = vld [vmem:[%s4126_s5 + $0xf8] sm:$0xff]  }
 0x5bd   : > { %v2614_v7 = vunpack.c.l.bf16 %v3743_v60  ;;  %v2607_v26 = vunpack.c.h.bf16 %v3740_v59 }
 0x5be   : > { %v3068_v28 = vadd.f32 %v3067_v3, %v2985_v27  ;;  %v3003_v3 = vmul.f32 %v5613_v45, %v2619_v6  ;;  %v3746_v45 = vld [vmem:[%s4126_s5 + $0xd8] sm:$0xff]  }
 0x5bf   : > { %v2834_v37 = vpop.permute.xlu1 %2833  ;;  %v2991_v41 = vmul.f32 %v2854_v58, %v2607_v26 }
 0x5c0   : > { %v3069_v15 = vrot.slane %v3068_v28, 4  ;;  %v2987_v5 = vmul.f32 %v2834_v37, %v2603_v18  ;;  %v2997_v37 = vmul.f32 %v5618_v0, %v2613_v4 }
 0x5c2   : > { %v3070_v30 = vadd.f32 %v3069_v15, %v3068_v28  ;;  %v3075_v47 = vadd.f32 %v2987_v5, %v2986_v2  ;;  %v3744_v28 = vld [vmem:[%s4126_s5 + $0xb8] sm:$0xff]   ;;  %v2617_v2 = vunpack.c.h.bf16 %v3746_v45 }
 0x5c3   : > { %v2874_v14 = vpop.permute.xlu1 %2873  ;;  %v2608_v9 = vunpack.c.l.bf16 %v3744_v28 }
 0x5c4   : > { %v3071_v61 = vrot.slane %v3070_v30, 2  ;;  %v2995_v25 = vmul.f32 %v2874_v14, %v2611_v21  ;;  %v3076_v29 = vadd.f32 %v3075_v47, %v2988_v24  ;;  %v2615_v14 = vunpack.c.h.bf16 %v3743_v60 }
 0x5c6   : > { %v3072_v49 = vadd.f32 %v3071_v61, %v3070_v30  ;;  %v3088_v1 = vadd.f32 %v2995_v25, %v2994_v19  ;;  %v3077_v23 = vadd.f32 %v3076_v29, %v2989_v34  ;;  %v2609_v61 = vunpack.c.h.bf16 %v3744_v28 }
 0x5c7   : > { %v2909_v43 = vpop.permute.xlu1 %2908  ;;  %v2999_v53 = vmul.f32 %v2894_v55, %v2615_v14 }
 0x5c8   : > { %v3073_v39 = vrot.slane %v3072_v49, 1  ;;  %v3002_v63 = vmul.f32 %v2909_v43, %v2618_v54 }
 0x5ca   : > { %v3074_v62 = vadd.f32 %v3073_v39, %v3072_v49  ;;  %v2864_v49 = vpop.permute.xlu0 %2863  ;;  %v3101_v43 = vadd.f32 %v3003_v3, %v3002_v63 }
 0x5cb   : > { %v2879_v51 = vpop.permute.xlu1 %2878  ;;  %v2993_v42 = vmul.f32 %v2864_v49, %v2609_v61 }
 0x5cc   : > { %v5625_v13 = vsel %vm1631_vm10, %v3074_v62, %v3124_v52  ;;  %v2996_v50 = vmul.f32 %v2879_v51, %v2612_v40  ;;  %v3745_v62 = vld [vmem:[%s4126_s5 + $0xf0] sm:$0xff]   ;;  %v2616_v52 = vunpack.c.l.bf16 %v3746_v45  ;;  %v2624_v40 = vunpack.c.l.bf16 %v3747_v20 }
 0x5cd   : > { %v2622_v32 = vunpack.c.l.bf16 %v3745_v62  ;;  %v2623_v58 = vunpack.c.h.bf16 %v3745_v62 }
 0x5ce   : > { %v3089_v36 = vadd.f32 %v3088_v1, %v2996_v50  ;;  %v2904_v56 = vpop.permute.xlu0 %2903 }
 0x5cf   : > { %v2919_v22 = vpop.permute.xlu1 %2918  ;;  %v3001_v59 = vmul.f32 %v2904_v56, %v2617_v2  ;;  %v3007_v54 = vmul.f32 %v2934_v31, %v2623_v58 }
 0x5d0   : > { %v3004_v15 = vmul.f32 %v2919_v22, %v2620_v17  ;;  %v3090_v39 = vadd.f32 %v3089_v36, %v2997_v37  ;;  %v3005_v22 = vmul.f32 %v5620_v8, %v2621_v16  ;;  %v2625_v8 = vunpack.c.h.bf16 %v3747_v20 }
 0x5d2   : > { %v3102_v51 = vadd.f32 %v3101_v43, %v3004_v15 }
 0x5d3   : > { %v2849_v38 = vpop.permute.xlu1 %2848 }
 0x5d4   : > { %v2990_v11 = vmul.f32 %v2849_v38, %v2606_v10  ;;  %v3103_v38 = vadd.f32 %v3102_v51, %v3005_v22 }
 0x5d6   : > { %v3078_v30 = vadd.f32 %v3077_v23, %v2990_v11 }
 0x5d7   : > { %v2889_v44 = vpop.permute.xlu1 %2888 }
 0x5d8   : > { %v2998_v33 = vmul.f32 %v2889_v44, %v2614_v7  ;;  %v3079_v5 = vadd.f32 %v3078_v30, %v2991_v41 }
 0x5da   : > { %v3091_v35 = vadd.f32 %v3090_v39, %v2998_v33 }
 0x5db   : > { %v2929_v27 = vpop.permute.xlu1 %2928 }
 0x5dc   : > { %v3006_v12 = vmul.f32 %v2929_v27, %v2622_v32  ;;  %v3092_v46 = vadd.f32 %v3091_v35, %v2999_v53 }
 0x5de   : > { %v3104_v10 = vadd.f32 %v3103_v38, %v3006_v12 }
 0x5df   : > { %v2859_v18 = vpop.permute.xlu1 %2858 }
 0x5e0   : > { %v2992_v0 = vmul.f32 %v2859_v18, %v2608_v9  ;;  %v3105_v17 = vadd.f32 %v3104_v10, %v3007_v54 }
 0x5e2   : > { %v3080_v21 = vadd.f32 %v3079_v5, %v2992_v0 }
 0x5e3   : > { %v2899_v47 = vpop.permute.xlu1 %2898 }
 0x5e4   : > { %v3081_v24 = vadd.f32 %v3080_v21, %v2993_v42  ;;  %v3000_v25 = vmul.f32 %v2899_v47, %v2616_v52 }
 0x5e6   : > { %v3082_v19 = vrot.slane %v3081_v24, 4  ;;  %v3093_v29 = vadd.f32 %v3092_v46, %v3000_v25 }
 0x5e7   : > { %v2939_v48 = vpop.permute.xlu1 %2938 }
 0x5e8   : > { %v3083_v55 = vadd.f32 %v3082_v19, %v3081_v24  ;;  %v3094_v50 = vadd.f32 %v3093_v29, %v3001_v59  ;;  %v3008_v6 = vmul.f32 %v2939_v48, %v2624_v40 }
 0x5ea   : > { %v3084_v4 = vrot.slane %v3083_v55, 2  ;;  %v3095_v57 = vrot.slane %v3094_v50, 4  ;;  %v3106_v1 = vadd.f32 %v3105_v17, %v3008_v6 }
 0x5eb   : > { %v2944_v44 = vpop.permute.xlu1 %2943 }
 0x5ec   : > { %v3096_v34 = vadd.f32 %v3095_v57, %v3094_v50  ;;  %v3009_v11 = vmul.f32 %v2944_v44, %v2625_v8  ;;  %v3085_v60 = vadd.f32 %v3084_v4, %v3083_v55 }
 0x5ee   : > { %v3097_v7 = vrot.slane %v3096_v34, 2  ;;  %v3107_v26 = vadd.f32 %v3106_v1, %v3009_v11  ;;  %v3086_v23 = vrot.slane %v3085_v60, 1 }
 0x5f0   : > { %v3098_v63 = vadd.f32 %v3097_v7, %v3096_v34  ;;  %v3108_v36 = vrot.slane %v3107_v26, 4  ;;  %v3087_v28 = vadd.f32 %v3086_v23, %v3085_v60 }
 0x5f2   : > { %v3109_v3 = vadd.f32 %v3108_v36, %v3107_v26  ;;  %v3099_v31 = vrot.slane %v3098_v63, 1  ;;  %v3126_v33 = vsel %vm1633_vm11, %v3087_v28, %v5625_v13 }
 0x5f4   : > { %v3110_v27 = vrot.slane %v3109_v3, 2  ;;  %v3100_v37 = vadd.f32 %v3099_v31, %v3098_v63 }
 0x5f6   : > { %v3111_v9 = vadd.f32 %v3110_v27, %v3109_v3  ;;  %v3127_v16 = vsel %vm1635_vm12, %v3100_v37, %v3126_v33 }
 0x5f8   : > { %v3112_v15 = vrot.slane %v3111_v9, 1 }
 0x5fa   : > { %v3113_v30 = vadd.f32 %v3112_v15, %v3111_v9 }
 0x5fc   : > { %v3128_v14 = vsel %vm1637_vm13, %v3113_v30, %v3127_v16 }
 0x5fd   : > { %3130 = vst [vmem:[%s267_s13] sm:$0xff] %v3128_v14 }
 0x5fe   : > { %3849 = shalt.err (!%p3846_p2)
}
 0x5ff   : > { %s3850_s2 = scalar_lea.hbm %s5653_s10, 128  ;;  %s3854_s0 = scalar_lea.hbm %s5702_s4, 256 }
 0x600   : > { %p3851_p6 = scmp.ne.s32.totalorder %s5653_s10, %s3850_s2  ;;  %p3855_p12 = scmp.lt.u32.totalorder %s5653_s10, %s5702_s4 }
 0x601   : > { %p3856_p11 = scmp.lt.u32.totalorder %s3854_s0, %s3850_s2  ;;  %p3858_p10 = scmp.lt.u32.totalorder %s3850_s2, %s5653_s10 }
 0x602   : > { %p3852_p8 = pnand %p3851_p6, %p5981_p13 }
 0x603   : > { %p3857_p0 = por %p3856_p11, %p3855_p12 }
 0x604   : > { %p3853_p4 = pneg %p3852_p8 }
 0x605   : > { %p3859_p3 = por %p3858_p10, %p3857_p0 }
 0x607   : > { %p3860_p7 = pnand %p3859_p3, %p3853_p4 }
 0x609   : > { %3863 = shalt.err (!%p3860_p7)
}
 0x60a   : > { %3453 = dma.vmem_to_hbm [thread:$0]  (%p5981_p13), %s5655_s26, 128, %s5653_s10, %s3132_s19  }
 0x60b PF: > { %s3157_s20 = sand.u32 1, %s3898_s15   ;;  %p5982_p9 = scmp.ne.s32.totalorder %s5801_s22, 0 }
 0x60c   : > { %p5983_p1 = scmp.ge.s32.totalorder %s3910_s18, 2  ;;  %s3158_s21 = scalar_lea.sflag [#allocation4], %s3157_s20 }
 0x60e   : > { %p3467_p5 = pnand %p5983_p1, %p5982_p9 }
 0x610   : > { %3893 = dma.done.wait (!%p3467_p5), %s3158_s21, 128  }
 0x611   : > { %3895 = vsyncadd (!%p3467_p5), %s3158_s21, 4294967168  ;;  %p20_p2 = scmp.ge.s32.totalorder %s4001_s27, 4   ;;  %s5984_s15 = smov %s3902_s16 }
 0x612   : > { %s5985_s16 = smov %s3906_s17  ;;  %s5986_s17 = smov %s4035_s24 }
 0x613   : > { %s5987_s18 = smov %s4001_s27  ;;  %22 = sbr.rel (!%p20_p2) target bundleno = 10 (0xa), region = 98 }
 0x61a   :  { %3163 = vsyncpa [#allocation3], 1 }
 0x61b   :  { %3165 = vsyncpa [#allocation3 + $0x1], 1 }
 0x61c   :  { %3166 = vsyncpa [#allocation6], 1 }
 0x61d   :  { %3168 = vsyncpa [#allocation6 + $0x1], 1 }
 0x61e   :  { %3169 = vsyncpa [#allocation4], 1 }
 0x61f   :  { %3171 = vsyncpa [#allocation4 + $0x1], 1 }

</bundles_post_ra>
